<compile_context>
chip_gen: v6e
topology: v6e:2x2x1
jax: 0.10.0
libtpu: 0.0.40
codegen_flags: <defaults>
</compile_context>

<pallas_src>
import functools
import math

import jax
import jax.numpy as jnp
import numpy as np
from jax.experimental import pallas as pl
from jax.experimental.pallas import tpu as pltpu


# ---------------------------------------------------------------------------
# helpers
# ---------------------------------------------------------------------------
def _rep_spec(shape):
    """Full-array BlockSpec replicated across the (1-D) grid."""
    nd = len(shape)

    def index_map(i):
        return (0,) * nd

    return pl.BlockSpec(shape, index_map)


def _fold_bn(bn, eps=1e-5):
    gamma, beta, mean, var = bn
    scale = gamma / jnp.sqrt(var + eps)
    return scale, beta - mean * scale


# ---------------------------------------------------------------------------
# Kernel 1: fused GEMM + BatchNorm(affine) + ReLU  (single dense store)
#   used for the latent ConvT(k3,s1,p0) (a pure GEMM on the 1x1 input) and for
#   every ConvT(k4,s2,p1) pyramid stage (9-tap im2col + block-structured
#   weights -> all four stride-2 parity planes come out as one lane-dense
#   (M, 4*cout) tile).
# ---------------------------------------------------------------------------
def _gemm_bn_relu_kernel(x_ref, w_ref, scale_ref, bias_ref, o_ref):
    y = jnp.dot(x_ref[...], w_ref[...], preferred_element_type=jnp.float32)
    o_ref[...] = jnp.maximum(y * scale_ref[...] + bias_ref[...],
                             0.0).astype(o_ref.dtype)


def _gemm_bn_relu(x, wmat, scale, bias):
    m, k = x.shape
    n_out = wmat.shape[1]
    cost = pl.CostEstimate(
        flops=2 * m * k * n_out,
        transcendentals=0,
        bytes_accessed=(x.size * x.dtype.itemsize
                        + wmat.size * wmat.dtype.itemsize
                        + 4 * (m * n_out + 2 * n_out)))
    return pl.pallas_call(
        _gemm_bn_relu_kernel,
        out_shape=jax.ShapeDtypeStruct((m, n_out), jnp.float32),
        grid=(1,),
        in_specs=[
            _rep_spec((m, k)),
            _rep_spec((k, n_out)),
            _rep_spec((1, n_out)),
            _rep_spec((1, n_out)),
        ],
        out_specs=_rep_spec((m, n_out)),
        compiler_params=pltpu.CompilerParams(dimension_semantics=("arbitrary",)),
        cost_estimate=cost,
    )(x, wmat, scale.reshape(1, -1), bias.reshape(1, -1))


# ---------------------------------------------------------------------------
# Kernel 2: fused CBAM (channel + spatial attention) on (h*w, c) blocks
# ---------------------------------------------------------------------------
@functools.lru_cache(maxsize=None)
def _spatial_structure(h, w, k=7):
    """0/1 tap structure of a same-padded kxk conv as (k*k, h*w, h*w)."""
    hw = h * w
    pad = k // 2
    s = np.zeros((k * k, hw, hw), np.float32)
    for ki in range(k):
        for kj in range(k):
            t = ki * k + kj
            for i in range(h):
                ii = i + ki - pad
                if not 0 <= ii < h:
                    continue
                for j in range(w):
                    jj = j + kj - pad
                    if 0 <= jj < w:
                        s[t, i * w + j, ii * w + jj] = 1.0
    return s


def _spatial_conv_matrices(conv_w, bn, h, w, eps=1e-5):
    """Fold the 7x7 spatial-attention conv + its BatchNorm into two dense
    (h*w, h*w) matrices (avg-/max-pooled inputs) plus a scalar bias."""
    gamma, beta, mean, var = bn
    s_bn = gamma / jnp.sqrt(var + eps)                      # (1,)
    wf = (conv_w[0] * s_bn[0]).reshape(2, -1)               # (2, 49), BN folded
    struct = jnp.asarray(_spatial_structure(h, w))          # (49, hw, hw)
    m_avg = jnp.tensordot(wf[0], struct, axes=([0], [0]))   # (hw, hw)
    m_max = jnp.tensordot(wf[1], struct, axes=([0], [0]))   # (hw, hw)
    return m_avg, m_max, beta - mean * s_bn


def _cbam_kernel(x_ref, w1_ref, b1_ref, w2_ref, b2_ref, ma_ref, mm_ref,
                 cb_ref, o_ref):
    x = x_ref[0]                                             # (hw, c)

    # ---- channel attention: one MLP pass on stacked [avg; max] pooling ----
    pooled = jnp.concatenate(
        [jnp.mean(x, axis=0, keepdims=True),
         jnp.max(x, axis=0, keepdims=True)], axis=0)         # (2, c)
    hid = jnp.maximum(
        jnp.dot(pooled, w1_ref[...], preferred_element_type=jnp.float32)
        + b1_ref[...], 0.0)                                  # (2, cr)
    att = (jnp.dot(hid, w2_ref[...], preferred_element_type=jnp.float32)
           + b2_ref[...])                                    # (2, c)
    gate_c = jax.nn.sigmoid(jnp.sum(att, axis=0, keepdims=True))   # (1, c)
    y = x * gate_c                                           # (hw, c)

    # ---- spatial attention: 7x7 conv + BN folded into two MXU dots ----
    sa_avg = jnp.mean(y, axis=1, keepdims=True)              # (hw, 1)
    sa_max = jnp.max(y, axis=1, keepdims=True)               # (hw, 1)
    s = (jnp.dot(ma_ref[...], sa_avg, preferred_element_type=jnp.float32)
         + jnp.dot(mm_ref[...], sa_max, preferred_element_type=jnp.float32)
         + cb_ref[0])                                        # (hw, 1)
    o_ref[0] = (y * jax.nn.sigmoid(s)).astype(o_ref.dtype)


def _cbam_pallas(x, p, h, w, eps=1e-5):
    # x: (n, h*w, c) float32
    n, hw, c = x.shape
    cr = p["w1"].shape[1]
    m_avg, m_max, cb = _spatial_conv_matrices(p["conv_w"], p["bn"], h, w, eps)
    cost = pl.CostEstimate(
        flops=n * (8 * c * cr + 4 * hw * hw + 8 * hw * c),
        transcendentals=n * (c + hw),
        bytes_accessed=8 * n * hw * c + 8 * hw * hw
        + 4 * (2 * c * cr + cr + 2 * c))
    return pl.pallas_call(
        _cbam_kernel,
        out_shape=jax.ShapeDtypeStruct((n, hw, c), x.dtype),
        grid=(n,),
        in_specs=[
            pl.BlockSpec((1, hw, c), lambda i: (i, 0, 0)),
            _rep_spec((c, cr)),
            _rep_spec((1, cr)),
            _rep_spec((cr, c)),
            _rep_spec((1, c)),
            _rep_spec((hw, hw)),
            _rep_spec((hw, hw)),
            pl.BlockSpec(memory_space=pltpu.MemorySpace.SMEM),
        ],
        out_specs=pl.BlockSpec((1, hw, c), lambda i: (i, 0, 0)),
        compiler_params=pltpu.CompilerParams(dimension_semantics=("parallel",)),
        cost_estimate=cost,
    )(x, p["w1"], p["b1"].reshape(1, -1), p["w2"], p["b2"].reshape(1, -1),
      m_avg, m_max, cb)


# ---------------------------------------------------------------------------
# ConvTranspose(k4, s2, p1) + BN + ReLU  (one lane-dense GEMM per stage)
# ---------------------------------------------------------------------------
# (parity, tap-offset d) -> transposed-conv kernel index; missing -> zero block
_KI_S2 = {(0, 0): 3, (0, 1): 1, (1, 1): 2, (1, 2): 0}


def _im2col_3x3(x):
    """9-tap im2col of the same-padded 3x3 neighbourhood, NHWC -> (n, h*w, 9*cin)."""
    n, h, w, cin = x.shape
    xp = jnp.pad(x, ((0, 0), (1, 1), (1, 1), (0, 0)))
    cols = [xp[:, di:di + h, dj:dj + w, :].reshape(n, h * w, cin)
            for di in range(3) for dj in range(3)]
    return jnp.concatenate(cols, axis=-1)


def _convt4s2_bn_relu_pallas(x, wt, scale, bias):
    """ConvTranspose2d(k=4, s=2, p=1) + BN + ReLU; NHWC in -> NHWC (2h, 2w)."""
    n, h, w, cin = x.shape
    cout = wt.shape[1]

    xcol = _im2col_3x3(x.astype(jnp.bfloat16)).reshape(n * h * w, 9 * cin)

    # block-structured weights: rows ordered (tap di, dj, cin), columns ordered
    # (parity p = 2*pi+pj, cout); taps a parity plane never reads are zero.
    wb = wt.astype(jnp.bfloat16)
    zero_blk = jnp.zeros((cin, cout), jnp.bfloat16)
    rows = []
    for di in range(3):
        for dj in range(3):
            blk = []
            for pi in range(2):
                for pj in range(2):
                    ki = _KI_S2.get((pi, di))
                    kj = _KI_S2.get((pj, dj))
                    blk.append(zero_blk if ki is None or kj is None
                               else wb[:, :, ki, kj])
            rows.append(jnp.concatenate(blk, axis=1))        # (cin, 4*cout)
    wcol = jnp.concatenate(rows, axis=0)                      # (9*cin, 4*cout)

    out = _gemm_bn_relu(xcol, wcol, jnp.tile(scale, 4), jnp.tile(bias, 4))

    # free de-interleave of the four parity planes back to (2h, 2w)
    out = out.reshape(n, h, w, 2, 2, cout)
    out = jnp.transpose(out, (0, 1, 3, 2, 4, 5)).reshape(n, 2 * h, 2 * w, cout)
    return out


# ---------------------------------------------------------------------------
# Kernel 3: final ConvTranspose(k3, s1, p1) + tanh, transposed GEMM so the
#           store is lane-dense and the output is already NCHW.
# ---------------------------------------------------------------------------
def _convt3s1_tanh_kernel(wt_ref, xt_ref, o_ref):
    y = jnp.dot(wt_ref[...], xt_ref[0], preferred_element_type=jnp.float32)
    o_ref[0] = jnp.tanh(y).astype(o_ref.dtype)


def _convt3s1_tanh_pallas(x, wt):
    """Final ConvTranspose2d(k=3, s=1, p=1) + tanh; NHWC in -> NCHW out."""
    n, h, w, cin = x.shape
    cout = wt.shape[1]
    hw = h * w

    xcol_t = jnp.transpose(_im2col_3x3(x.astype(jnp.bfloat16)), (0, 2, 1))

    wb = wt.astype(jnp.bfloat16)
    wrows = [wb[:, :, 2 - di, 2 - dj] for di in range(3) for dj in range(3)]
    wcol_t = jnp.transpose(jnp.concatenate(wrows, axis=0))    # (cout, 9*cin)

    cost = pl.CostEstimate(
        flops=2 * n * hw * 9 * cin * cout,
        transcendentals=n * hw * cout,
        bytes_accessed=2 * (xcol_t.size + wcol_t.size) + 4 * n * cout * hw)
    out = pl.pallas_call(
        _convt3s1_tanh_kernel,
        out_shape=jax.ShapeDtypeStruct((n, cout, hw), jnp.float32),
        grid=(n,),
        in_specs=[
            _rep_spec((cout, 9 * cin)),
            pl.BlockSpec((1, 9 * cin, hw), lambda i: (i, 0, 0)),
        ],
        out_specs=pl.BlockSpec((1, cout, hw), lambda i: (i, 0, 0)),
        compiler_params=pltpu.CompilerParams(dimension_semantics=("parallel",)),
        cost_estimate=cost,
    )(wcol_t, xcol_t)
    return out.reshape(n, cout, h, w)                         # NCHW for free


# ---------------------------------------------------------------------------
# Full decoder forward (Pallas path; NCHW in / NCHW out like PyTorch)
# ---------------------------------------------------------------------------
def decoder_forward_pallas(input_tensor, params):
    n = input_tensor.shape[0]
    z = input_tensor.reshape(n, -1)                           # (N, Z, 1, 1) -> (N, Z)

    # latent stage: ConvT(k3,s1,p0) on a 1x1 input is a pure GEMM
    wlat = params["latent"]["w"]                              # (Z, C0, 3, 3)
    zc, c0 = wlat.shape[0], wlat.shape[1]
    wmat = jnp.transpose(wlat, (0, 2, 3, 1)).reshape(zc, 9 * c0)
    s0, b0 = _fold_bn(params["latent"]["bn"])
    x = _gemm_bn_relu(z, wmat, jnp.tile(s0, 9), jnp.tile(b0, 9))
    h = w = 3
    x = _cbam_pallas(x.reshape(n, h * w, c0),
                     params["latent"]["cbam"], h, w).reshape(n, h, w, c0)

    # inverse pyramid
    for layer in params["pyramid"]:
        s, b = _fold_bn(layer["bn"])
        x = _convt4s2_bn_relu_pallas(x, layer["w"], s, b)
        n, h, w, c = x.shape
        x = _cbam_pallas(x.reshape(n, h * w, c),
                         layer["cbam"], h, w).reshape(n, h, w, c)

    # final ConvT(k3,s1,p1) + tanh
    return _convt3s1_tanh_pallas(x, params["final_w"])


# ---------------------------------------------------------------------------
# Pure-JAX reference (NCHW, lax convs) mirroring the PyTorch module
# ---------------------------------------------------------------------------
def _bn_ref(x, bn, eps=1e-5):
    gamma, beta, mean, var = bn
    s = gamma / jnp.sqrt(var + eps)
    return x * s[None, :, None, None] + (beta - mean * s)[None, :, None, None]


def _conv_transpose_ref(x, w, stride, padding):
    # x: (N, Cin, H, W); w: (Cin, Cout, k, k)  (PyTorch ConvTranspose2d layout)
    k = w.shape[-1]
    w_conv = jnp.transpose(w[:, :, ::-1, ::-1], (1, 0, 2, 3))   # (Cout, Cin, k, k)
    return jax.lax.conv_general_dilated(
        x, w_conv, window_strides=(1, 1),
        padding=[(k - 1 - padding, k - 1 - padding)] * 2,
        lhs_dilation=(stride, stride),
        dimension_numbers=("NCHW", "OIHW", "NCHW"),
        precision=jax.lax.Precision.HIGHEST)


def _conv_ref(x, w, padding):
    return jax.lax.conv_general_dilated(
        x, w, window_strides=(1, 1), padding=[(padding, padding)] * 2,
        dimension_numbers=("NCHW", "OIHW", "NCHW"),
        precision=jax.lax.Precision.HIGHEST)


def _cbam_ref(x, p):
    avg = jnp.mean(x, axis=(2, 3))
    mx = jnp.max(x, axis=(2, 3))

    def mlp(v):
        return jnp.maximum(v @ p["w1"] + p["b1"], 0.0) @ p["w2"] + p["b2"]

    y = x * jax.nn.sigmoid(mlp(avg) + mlp(mx))[:, :, None, None]
    sa = jnp.concatenate([jnp.mean(y, axis=1, keepdims=True),
                          jnp.max(y, axis=1, keepdims=True)], axis=1)
    s = _bn_ref(_conv_ref(sa, p["conv_w"], padding=3), p["bn"])
    return y * jax.nn.sigmoid(s)


def decoder_reference(input_tensor, params):
    x = _conv_transpose_ref(input_tensor, params["latent"]["w"], 1, 0)
    x = jnp.maximum(_bn_ref(x, params["latent"]["bn"]), 0.0)
    x = _cbam_ref(x, params["latent"]["cbam"])
    for layer in params["pyramid"]:
        x = _conv_transpose_ref(x, layer["w"], 2, 1)
        x = jnp.maximum(_bn_ref(x, layer["bn"]), 0.0)
        x = _cbam_ref(x, layer["cbam"])
    x = _conv_transpose_ref(x, params["final_w"], 1, 1)
    return jnp.tanh(x)


# ---------------------------------------------------------------------------
# Parameter construction mirroring the PyTorch module's structure
# ---------------------------------------------------------------------------
def _make_bn(key, c):
    kg, kb, km, kv = jax.random.split(key, 4)
    return (1.0 + 0.1 * jax.random.normal(kg, (c,), jnp.float32),
            0.1 * jax.random.normal(kb, (c,), jnp.float32),
            0.1 * jax.random.normal(km, (c,), jnp.float32),
            0.5 + jax.random.uniform(kv, (c,), jnp.float32))


def _make_cbam_params(key, c, reduction=16):
    k1, k2, k3, k4, k5, k6 = jax.random.split(key, 6)
    cr = c // reduction
    return {
        "w1": jax.random.normal(k1, (c, cr), jnp.float32) / (c ** 0.5),
        "b1": 0.1 * jax.random.normal(k2, (cr,), jnp.float32),
        "w2": jax.random.normal(k3, (cr, c), jnp.float32) / (cr ** 0.5),
        "b2": 0.1 * jax.random.normal(k4, (c,), jnp.float32),
        "conv_w": 0.1 * jax.random.normal(k5, (1, 2, 7, 7), jnp.float32),
        "bn": _make_bn(k6, 1),
    }


def make_decoder_params(key, input_size, latent_vec_size, num_input_channels,
                        n_features):
    exp_factor = math.ceil(math.log(min(input_size) // 2, 2)) - 2
    n_in = n_features * 2 ** exp_factor
    keys = jax.random.split(key, 16)

    params = {
        "latent": {
            "w": jax.random.normal(keys[0], (latent_vec_size, n_in, 3, 3),
                                   jnp.float32) / (latent_vec_size ** 0.5),
            "bn": _make_bn(keys[1], n_in),
            "cbam": _make_cbam_params(keys[2], n_in),
        }
    }

    pyramid = []
    pyramid_dim = min(input_size) // 2
    feats = n_in
    kidx = 3
    while pyramid_dim > 4:
        cin, cout = feats, feats // 2
        pyramid.append({
            "w": jax.random.normal(keys[kidx], (cin, cout, 4, 4),
                                   jnp.float32) / ((cin * 16) ** 0.5),
            "bn": _make_bn(keys[kidx + 1], cout),
            "cbam": _make_cbam_params(keys[kidx + 2], cout),
        })
        kidx += 3
        feats = cout
        pyramid_dim //= 2
    params["pyramid"] = pyramid

    # NOTE: extra_layers defaults to 0 in the module -> none instantiated here.
    params["final_w"] = (jax.random.normal(
        keys[15], (feats, num_input_channels, 3, 3), jnp.float32)
        / ((feats * 9) ** 0.5))
    return params


# ---------------------------------------------------------------------------
if __name__ == "__main__":
    key = jax.random.PRNGKey(0)
    kp, kz = jax.random.split(key)

    input_size = (16, 16)
    latent_vec_size = 32
    num_input_channels = 3
    n_features = 32
    batch = 2

    params = make_decoder_params(kp, input_size, latent_vec_size,
                                 num_input_channels, n_features)
    x_in = jax.random.normal(kz, (batch, latent_vec_size, 1, 1), jnp.float32)

    fwd = jax.jit(decoder_forward_pallas)
    out = jax.block_until_ready(fwd(x_in, params))

    ref = decoder_reference(x_in, params)
    assert out.shape == ref.shape, (out.shape, ref.shape)
    max_err = float(jnp.max(jnp.abs(out - ref)))
    assert max_err < 2e-2, f"mismatch vs reference: max abs err {max_err}"

    print("KERNEL_OK")
</pallas_src>

<mosaic_0001>
module attributes {stable_mosaic.version = 11 : i64} {
  func.func @_gemm_bn_relu_kernel(%arg0: i32, %arg1: memref<2x32xf32, #tpu.memory_space<vmem>>, %arg2: memref<32x576xf32, #tpu.memory_space<vmem>>, %arg3: memref<1x576xf32, #tpu.memory_space<vmem>>, %arg4: memref<1x576xf32, #tpu.memory_space<vmem>>, %arg5: memref<2x576xf32, #tpu.memory_space<vmem>>) attributes {dimension_semantics = [#tpu.dimension_semantics<arbitrary>], iteration_bounds = array<i64: 1>, scalar_prefetch = 0 : i64, scratch_operands = 0 : i64, tpu.core_type = #tpu.core_type<tc>, window_params = [{pipeline_mode = #tpu.pipeline_mode<synchronous>, transform_indices = @transform_0, window_bounds = array<i64: 2, 32>}, {pipeline_mode = #tpu.pipeline_mode<synchronous>, transform_indices = @transform_1, window_bounds = array<i64: 32, 576>}, {pipeline_mode = #tpu.pipeline_mode<synchronous>, transform_indices = @transform_2, window_bounds = array<i64: 1, 576>}, {pipeline_mode = #tpu.pipeline_mode<synchronous>, transform_indices = @transform_3, window_bounds = array<i64: 1, 576>}, {pipeline_mode = #tpu.pipeline_mode<synchronous>, transform_indices = @transform_4, window_bounds = array<i64: 2, 576>}]} {
    %c0 = arith.constant 0 : index
    %c0_0 = arith.constant 0 : index
    %0 = vector.load %arg1[%c0, %c0_0] : memref<2x32xf32, #tpu.memory_space<vmem>>, vector<2x32xf32>
    %c0_1 = arith.constant 0 : index
    %c0_2 = arith.constant 0 : index
    %1 = vector.load %arg2[%c0_1, %c0_2] : memref<32x576xf32, #tpu.memory_space<vmem>>, vector<32x576xf32>
    %cst = arith.constant dense<0.000000e+00> : vector<2x576xf32>
    %2 = tpu.matmul %0, %1, %cst {dimension_numbers = #tpu.dot_dimension_numbers<[1], [0], [0], [1], [0, 0, 1, 1], [], []>} : vector<2x32xf32>, vector<32x576xf32>, vector<2x576xf32> -> vector<2x576xf32>
    %c0_3 = arith.constant 0 : index
    %c0_4 = arith.constant 0 : index
    %3 = vector.load %arg3[%c0_3, %c0_4] : memref<1x576xf32, #tpu.memory_space<vmem>>, vector<1x576xf32>
    %4 = vector.broadcast %3 : vector<1x576xf32> to vector<2x576xf32>
    %5 = arith.mulf %2, %4 : vector<2x576xf32>
    %c0_5 = arith.constant 0 : index
    %c0_6 = arith.constant 0 : index
    %6 = vector.load %arg4[%c0_5, %c0_6] : memref<1x576xf32, #tpu.memory_space<vmem>>, vector<1x576xf32>
    %7 = vector.broadcast %6 : vector<1x576xf32> to vector<2x576xf32>
    %8 = arith.addf %5, %7 : vector<2x576xf32>
    %cst_7 = arith.constant 0.000000e+00 : f32
    %9 = vector.broadcast %cst_7 : f32 to vector<2x576xf32>
    %10 = arith.maximumf %8, %9 : vector<2x576xf32>
    %c0_8 = arith.constant 0 : index
    %c0_9 = arith.constant 0 : index
    %11 = vector.load %arg5[%c0_8, %c0_9] : memref<2x576xf32, #tpu.memory_space<vmem>>, vector<2x576xf32>
    tpu.vector_store %arg5[%c0_8, %c0_9], %10 {strides = array<i32>} : memref<2x576xf32, #tpu.memory_space<vmem>>, vector<2x576xf32>,
    return
  }
  func.func @transform_0(%arg0: i32) -> (i32, i32) {
    %c0_i32 = arith.constant 0 : i32
    %c0_i32_0 = arith.constant 0 : i32
    %c0_i32_1 = arith.constant 0 : i32
    return %c0_i32, %c0_i32_0 : i32, i32
  }
  func.func @transform_1(%arg0: i32) -> (i32, i32) {
    %c0_i32 = arith.constant 0 : i32
    %c0_i32_0 = arith.constant 0 : i32
    %c0_i32_1 = arith.constant 0 : i32
    return %c0_i32, %c0_i32_0 : i32, i32
  }
  func.func @transform_2(%arg0: i32) -> (i32, i32) {
    %c0_i32 = arith.constant 0 : i32
    %c0_i32_0 = arith.constant 0 : i32
    %c0_i32_1 = arith.constant 0 : i32
    return %c0_i32, %c0_i32_0 : i32, i32
  }
  func.func @transform_3(%arg0: i32) -> (i32, i32) {
    %c0_i32 = arith.constant 0 : i32
    %c0_i32_0 = arith.constant 0 : i32
    %c0_i32_1 = arith.constant 0 : i32
    return %c0_i32, %c0_i32_0 : i32, i32
  }
  func.func @transform_4(%arg0: i32) -> (i32, i32) {
    %c0_i32 = arith.constant 0 : i32
    %c0_i32_0 = arith.constant 0 : i32
    %c0_i32_1 = arith.constant 0 : i32
    return %c0_i32, %c0_i32_0 : i32, i32
  }
}

module attributes {stable_mosaic.version = 11 : i64} {
  func.func @_cbam_kernel(%arg0: i32, %arg1: memref<1x9x64xf32, #tpu.memory_space<vmem>>, %arg2: memref<64x4xf32, #tpu.memory_space<vmem>>, %arg3: memref<1x4xf32, #tpu.memory_space<vmem>>, %arg4: memref<4x64xf32, #tpu.memory_space<vmem>>, %arg5: memref<1x64xf32, #tpu.memory_space<vmem>>, %arg6: memref<9x9xf32, #tpu.memory_space<vmem>>, %arg7: memref<9x9xf32, #tpu.memory_space<vmem>>, %arg8: memref<1xf32, #tpu.memory_space<smem>>, %arg9: memref<1x9x64xf32, #tpu.memory_space<vmem>>) attributes {dimension_semantics = [#tpu.dimension_semantics<parallel>], iteration_bounds = array<i64: 2>, scalar_prefetch = 0 : i64, scratch_operands = 0 : i64, tpu.core_type = #tpu.core_type<tc>, window_params = [{transform_indices = @transform_0, window_bounds = array<i64: 1, 9, 64>}, {pipeline_mode = #tpu.pipeline_mode<synchronous>, transform_indices = @transform_1, window_bounds = array<i64: 64, 4>}, {pipeline_mode = #tpu.pipeline_mode<synchronous>, transform_indices = @transform_2, window_bounds = array<i64: 1, 4>}, {pipeline_mode = #tpu.pipeline_mode<synchronous>, transform_indices = @transform_3, window_bounds = array<i64: 4, 64>}, {pipeline_mode = #tpu.pipeline_mode<synchronous>, transform_indices = @transform_4, window_bounds = array<i64: 1, 64>}, {pipeline_mode = #tpu.pipeline_mode<synchronous>, transform_indices = @transform_5, window_bounds = array<i64: 9, 9>}, {pipeline_mode = #tpu.pipeline_mode<synchronous>, transform_indices = @transform_6, window_bounds = array<i64: 9, 9>}, {transform_indices = @transform_7, window_bounds = array<i64: 1>}, {transform_indices = @transform_8, window_bounds = array<i64: 1, 9, 64>}]} {
    %c0 = arith.constant 0 : index
    %c0_0 = arith.constant 0 : index
    %c0_1 = arith.constant 0 : index
    %0 = vector.load %arg1[%c0, %c0_0, %c0_1] : memref<1x9x64xf32, #tpu.memory_space<vmem>>, vector<1x9x64xf32>
    %1 = vector.shape_cast %0 : vector<1x9x64xf32> to vector<9x64xf32>
    %cst = arith.constant dense<0.000000e+00> : vector<64xf32>
    %2 = vector.multi_reduction <add>, %1, %cst [0] : vector<9x64xf32> to vector<64xf32>
    %3 = vector.shape_cast %2 : vector<64xf32> to vector<1x64xf32>
    %cst_2 = arith.constant 9.000000e+00 : f32
    %4 = vector.broadcast %cst_2 : f32 to vector<1x64xf32>
    %5 = arith.divf %3, %4 : vector<1x64xf32>
    %cst_3 = arith.constant dense<0xFF800000> : vector<64xf32>
    %6 = vector.multi_reduction <maximumf>, %1, %cst_3 [0] : vector<9x64xf32> to vector<64xf32>
    %7 = vector.shape_cast %6 : vector<64xf32> to vector<1x64xf32>
    %8 = tpu.concatenate %5, %7 in 0 : vector<1x64xf32>, vector<1x64xf32> -> vector<2x64xf32>
    %c0_4 = arith.constant 0 : index
    %c0_5 = arith.constant 0 : index
    %9 = vector.load %arg2[%c0_4, %c0_5] : memref<64x4xf32, #tpu.memory_space<vmem>>, vector<64x4xf32>
    %cst_6 = arith.constant dense<0.000000e+00> : vector<2x4xf32>
    %10 = tpu.matmul %8, %9, %cst_6 {dimension_numbers = #tpu.dot_dimension_numbers<[1], [0], [0], [1], [0, 0, 1, 1], [], []>} : vector<2x64xf32>, vector<64x4xf32>, vector<2x4xf32> -> vector<2x4xf32>
    %c0_7 = arith.constant 0 : index
    %c0_8 = arith.constant 0 : index
    %11 = vector.load %arg3[%c0_7, %c0_8] : memref<1x4xf32, #tpu.memory_space<vmem>>, vector<1x4xf32>
    %12 = vector.broadcast %11 : vector<1x4xf32> to vector<2x4xf32>
    %13 = arith.addf %10, %12 : vector<2x4xf32>
    %cst_9 = arith.constant 0.000000e+00 : f32
    %14 = vector.broadcast %cst_9 : f32 to vector<2x4xf32>
    %15 = arith.maximumf %13, %14 : vector<2x4xf32>
    %c0_10 = arith.constant 0 : index
    %c0_11 = arith.constant 0 : index
    %16 = vector.load %arg4[%c0_10, %c0_11] : memref<4x64xf32, #tpu.memory_space<vmem>>, vector<4x64xf32>
    %cst_12 = arith.constant dense<0.000000e+00> : vector<2x64xf32>
    %17 = tpu.matmul %15, %16, %cst_12 {dimension_numbers = #tpu.dot_dimension_numbers<[1], [0], [0], [1], [0, 0, 1, 1], [], []>} : vector<2x4xf32>, vector<4x64xf32>, vector<2x64xf32> -> vector<2x64xf32>
    %c0_13 = arith.constant 0 : index
    %c0_14 = arith.constant 0 : index
    %18 = vector.load %arg5[%c0_13, %c0_14] : memref<1x64xf32, #tpu.memory_space<vmem>>, vector<1x64xf32>
    %19 = vector.broadcast %18 : vector<1x64xf32> to vector<2x64xf32>
    %20 = arith.addf %17, %19 : vector<2x64xf32>
    %cst_15 = arith.constant dense<0.000000e+00> : vector<64xf32>
    %21 = vector.multi_reduction <add>, %20, %cst_15 [0] : vector<2x64xf32> to vector<64xf32>
    %22 = vector.shape_cast %21 : vector<64xf32> to vector<1x64xf32>
    %23 = arith.negf %22 : vector<1x64xf32>
    %24 = math.exp %23 : vector<1x64xf32>
    %cst_16 = arith.constant 1.000000e+00 : f32
    %25 = vector.broadcast %cst_16 : f32 to vector<1x64xf32>
    %26 = arith.addf %25, %24 : vector<1x64xf32>
    %27 = arith.divf %25, %26 : vector<1x64xf32>
    %28 = vector.broadcast %27 : vector<1x64xf32> to vector<9x64xf32>
    %29 = arith.mulf %1, %28 : vector<9x64xf32>
    %cst_17 = arith.constant dense<0.000000e+00> : vector<9xf32>
    %30 = vector.multi_reduction <add>, %29, %cst_17 [1] : vector<9x64xf32> to vector<9xf32>
    %31 = vector.shape_cast %30 : vector<9xf32> to vector<9x1xf32>
    %cst_18 = arith.constant 6.400000e+01 : f32
    %32 = vector.broadcast %cst_18 : f32 to vector<9x1xf32>
    %33 = arith.divf %31, %32 : vector<9x1xf32>
    %cst_19 = arith.constant dense<0xFF800000> : vector<9xf32>
    %34 = vector.multi_reduction <maximumf>, %29, %cst_19 [1] : vector<9x64xf32> to vector<9xf32>
    %35 = vector.shape_cast %34 : vector<9xf32> to vector<9x1xf32>
    %c0_20 = arith.constant 0 : index
    %c0_21 = arith.constant 0 : index
    %36 = vector.load %arg6[%c0_20, %c0_21] : memref<9x9xf32, #tpu.memory_space<vmem>>, vector<9x9xf32>
    %cst_22 = arith.constant dense<0.000000e+00> : vector<9x1xf32>
    %37 = tpu.matmul %36, %33, %cst_22 {dimension_numbers = #tpu.dot_dimension_numbers<[1], [0], [0], [1], [0, 0, 1, 1], [], []>} : vector<9x9xf32>, vector<9x1xf32>, vector<9x1xf32> -> vector<9x1xf32>
    %c0_23 = arith.constant 0 : index
    %c0_24 = arith.constant 0 : index
    %38 = vector.load %arg7[%c0_23, %c0_24] : memref<9x9xf32, #tpu.memory_space<vmem>>, vector<9x9xf32>
    %cst_25 = arith.constant dense<0.000000e+00> : vector<9x1xf32>
    %39 = tpu.matmul %38, %35, %cst_25 {dimension_numbers = #tpu.dot_dimension_numbers<[1], [0], [0], [1], [0, 0, 1, 1], [], []>} : vector<9x9xf32>, vector<9x1xf32>, vector<9x1xf32> -> vector<9x1xf32>
    %40 = arith.addf %37, %39 : vector<9x1xf32>
    %c0_26 = arith.constant 0 : index
    %41 = memref.load %arg8[%c0_26] : memref<1xf32, #tpu.memory_space<smem>>
    %42 = vector.broadcast %41 : f32 to vector<9x1xf32>
    %43 = arith.addf %40, %42 : vector<9x1xf32>
    %44 = arith.negf %43 : vector<9x1xf32>
    %45 = math.exp %44 : vector<9x1xf32>
    %cst_27 = arith.constant 1.000000e+00 : f32
    %46 = vector.broadcast %cst_27 : f32 to vector<9x1xf32>
    %47 = arith.addf %46, %45 : vector<9x1xf32>
    %48 = arith.divf %46, %47 : vector<9x1xf32>
    %49 = vector.broadcast %48 : vector<9x1xf32> to vector<9x64xf32>
    %50 = arith.mulf %29, %49 : vector<9x64xf32>
    %c0_28 = arith.constant 0 : index
    %c0_29 = arith.constant 0 : index
    %c0_30 = arith.constant 0 : index
    %51 = vector.load %arg9[%c0_28, %c0_29, %c0_30] : memref<1x9x64xf32, #tpu.memory_space<vmem>>, vector<1x9x64xf32>
    %52 = vector.shape_cast %51 : vector<1x9x64xf32> to vector<9x64xf32>
    %53 = vector.shape_cast %50 : vector<9x64xf32> to vector<1x9x64xf32>
    tpu.vector_store %arg9[%c0_28, %c0_29, %c0_30], %53 {strides = array<i32>} : memref<1x9x64xf32, #tpu.memory_space<vmem>>, vector<1x9x64xf32>,
    return
  }
  func.func @transform_0(%arg0: i32) -> (i32, i32, i32) {
    %c0_i32 = arith.constant 0 : i32
    %c0_i32_0 = arith.constant 0 : i32
    %c0_i32_1 = arith.constant 0 : i32
    return %arg0, %c0_i32, %c0_i32_0 : i32, i32, i32
  }
  func.func @transform_1(%arg0: i32) -> (i32, i32) {
    %c0_i32 = arith.constant 0 : i32
    %c0_i32_0 = arith.constant 0 : i32
    %c0_i32_1 = arith.constant 0 : i32
    return %c0_i32, %c0_i32_0 : i32, i32
  }
  func.func @transform_2(%arg0: i32) -> (i32, i32) {
    %c0_i32 = arith.constant 0 : i32
    %c0_i32_0 = arith.constant 0 : i32
    %c0_i32_1 = arith.constant 0 : i32
    return %c0_i32, %c0_i32_0 : i32, i32
  }
  func.func @transform_3(%arg0: i32) -> (i32, i32) {
    %c0_i32 = arith.constant 0 : i32
    %c0_i32_0 = arith.constant 0 : i32
    %c0_i32_1 = arith.constant 0 : i32
    return %c0_i32, %c0_i32_0 : i32, i32
  }
  func.func @transform_4(%arg0: i32) -> (i32, i32) {
    %c0_i32 = arith.constant 0 : i32
    %c0_i32_0 = arith.constant 0 : i32
    %c0_i32_1 = arith.constant 0 : i32
    return %c0_i32, %c0_i32_0 : i32, i32
  }
  func.func @transform_5(%arg0: i32) -> (i32, i32) {
    %c0_i32 = arith.constant 0 : i32
    %c0_i32_0 = arith.constant 0 : i32
    %c0_i32_1 = arith.constant 0 : i32
    return %c0_i32, %c0_i32_0 : i32, i32
  }
  func.func @transform_6(%arg0: i32) -> (i32, i32) {
    %c0_i32 = arith.constant 0 : i32
    %c0_i32_0 = arith.constant 0 : i32
    %c0_i32_1 = arith.constant 0 : i32
    return %c0_i32, %c0_i32_0 : i32, i32
  }
  func.func @transform_7(%arg0: i32) -> i32 {
    %c0_i32 = arith.constant 0 : i32
    %c0_i32_0 = arith.constant 0 : i32
    return %c0_i32 : i32
  }
  func.func @transform_8(%arg0: i32) -> (i32, i32, i32) {
    %c0_i32 = arith.constant 0 : i32
    %c0_i32_0 = arith.constant 0 : i32
    %c0_i32_1 = arith.constant 0 : i32
    return %arg0, %c0_i32, %c0_i32_0 : i32, i32, i32
  }
}

module attributes {stable_mosaic.version = 11 : i64} {
  func.func @_gemm_bn_relu_kernel(%arg0: i32, %arg1: memref<18x576xbf16, #tpu.memory_space<vmem>>, %arg2: memref<576x128xbf16, #tpu.memory_space<vmem>>, %arg3: memref<1x128xf32, #tpu.memory_space<vmem>>, %arg4: memref<1x128xf32, #tpu.memory_space<vmem>>, %arg5: memref<18x128xf32, #tpu.memory_space<vmem>>) attributes {dimension_semantics = [#tpu.dimension_semantics<arbitrary>], iteration_bounds = array<i64: 1>, scalar_prefetch = 0 : i64, scratch_operands = 0 : i64, tpu.core_type = #tpu.core_type<tc>, window_params = [{pipeline_mode = #tpu.pipeline_mode<synchronous>, transform_indices = @transform_0, window_bounds = array<i64: 18, 576>}, {pipeline_mode = #tpu.pipeline_mode<synchronous>, transform_indices = @transform_1, window_bounds = array<i64: 576, 128>}, {pipeline_mode = #tpu.pipeline_mode<synchronous>, transform_indices = @transform_2, window_bounds = array<i64: 1, 128>}, {pipeline_mode = #tpu.pipeline_mode<synchronous>, transform_indices = @transform_3, window_bounds = array<i64: 1, 128>}, {pipeline_mode = #tpu.pipeline_mode<synchronous>, transform_indices = @transform_4, window_bounds = array<i64: 18, 128>}]} {
    %c0 = arith.constant 0 : index
    %c0_0 = arith.constant 0 : index
    %0 = vector.load %arg1[%c0, %c0_0] : memref<18x576xbf16, #tpu.memory_space<vmem>>, vector<18x576xbf16>
    %c0_1 = arith.constant 0 : index
    %c0_2 = arith.constant 0 : index
    %1 = vector.load %arg2[%c0_1, %c0_2] : memref<576x128xbf16, #tpu.memory_space<vmem>>, vector<576x128xbf16>
    %cst = arith.constant dense<0.000000e+00> : vector<18x128xf32>
    %2 = tpu.matmul %0, %1, %cst {dimension_numbers = #tpu.dot_dimension_numbers<[1], [0], [0], [1], [0, 0, 1, 1], [], []>} : vector<18x576xbf16>, vector<576x128xbf16>, vector<18x128xf32> -> vector<18x128xf32>
    %c0_3 = arith.constant 0 : index
    %c0_4 = arith.constant 0 : index
    %3 = vector.load %arg3[%c0_3, %c0_4] : memref<1x128xf32, #tpu.memory_space<vmem>>, vector<1x128xf32>
    %4 = vector.broadcast %3 : vector<1x128xf32> to vector<18x128xf32>
    %5 = arith.mulf %2, %4 : vector<18x128xf32>
    %c0_5 = arith.constant 0 : index
    %c0_6 = arith.constant 0 : index
    %6 = vector.load %arg4[%c0_5, %c0_6] : memref<1x128xf32, #tpu.memory_space<vmem>>, vector<1x128xf32>
    %7 = vector.broadcast %6 : vector<1x128xf32> to vector<18x128xf32>
    %8 = arith.addf %5, %7 : vector<18x128xf32>
    %cst_7 = arith.constant 0.000000e+00 : f32
    %9 = vector.broadcast %cst_7 : f32 to vector<18x128xf32>
    %10 = arith.maximumf %8, %9 : vector<18x128xf32>
    %c0_8 = arith.constant 0 : index
    %c0_9 = arith.constant 0 : index
    %11 = vector.load %arg5[%c0_8, %c0_9] : memref<18x128xf32, #tpu.memory_space<vmem>>, vector<18x128xf32>
    tpu.vector_store %arg5[%c0_8, %c0_9], %10 {strides = array<i32>} : memref<18x128xf32, #tpu.memory_space<vmem>>, vector<18x128xf32>,
    return
  }
  func.func @transform_0(%arg0: i32) -> (i32, i32) {
    %c0_i32 = arith.constant 0 : i32
    %c0_i32_0 = arith.constant 0 : i32
    %c0_i32_1 = arith.constant 0 : i32
    return %c0_i32, %c0_i32_0 : i32, i32
  }
  func.func @transform_1(%arg0: i32) -> (i32, i32) {
    %c0_i32 = arith.constant 0 : i32
    %c0_i32_0 = arith.constant 0 : i32
    %c0_i32_1 = arith.constant 0 : i32
    return %c0_i32, %c0_i32_0 : i32, i32
  }
  func.func @transform_2(%arg0: i32) -> (i32, i32) {
    %c0_i32 = arith.constant 0 : i32
    %c0_i32_0 = arith.constant 0 : i32
    %c0_i32_1 = arith.constant 0 : i32
    return %c0_i32, %c0_i32_0 : i32, i32
  }
  func.func @transform_3(%arg0: i32) -> (i32, i32) {
    %c0_i32 = arith.constant 0 : i32
    %c0_i32_0 = arith.constant 0 : i32
    %c0_i32_1 = arith.constant 0 : i32
    return %c0_i32, %c0_i32_0 : i32, i32
  }
  func.func @transform_4(%arg0: i32) -> (i32, i32) {
    %c0_i32 = arith.constant 0 : i32
    %c0_i32_0 = arith.constant 0 : i32
    %c0_i32_1 = arith.constant 0 : i32
    return %c0_i32, %c0_i32_0 : i32, i32
  }
}

module attributes {stable_mosaic.version = 11 : i64} {
  func.func @_cbam_kernel(%arg0: i32, %arg1: memref<1x36x32xf32, #tpu.memory_space<vmem>>, %arg2: memref<32x2xf32, #tpu.memory_space<vmem>>, %arg3: memref<1x2xf32, #tpu.memory_space<vmem>>, %arg4: memref<2x32xf32, #tpu.memory_space<vmem>>, %arg5: memref<1x32xf32, #tpu.memory_space<vmem>>, %arg6: memref<36x36xf32, #tpu.memory_space<vmem>>, %arg7: memref<36x36xf32, #tpu.memory_space<vmem>>, %arg8: memref<1xf32, #tpu.memory_space<smem>>, %arg9: memref<1x36x32xf32, #tpu.memory_space<vmem>>) attributes {dimension_semantics = [#tpu.dimension_semantics<parallel>], iteration_bounds = array<i64: 2>, scalar_prefetch = 0 : i64, scratch_operands = 0 : i64, tpu.core_type = #tpu.core_type<tc>, window_params = [{transform_indices = @transform_0, window_bounds = array<i64: 1, 36, 32>}, {pipeline_mode = #tpu.pipeline_mode<synchronous>, transform_indices = @transform_1, window_bounds = array<i64: 32, 2>}, {pipeline_mode = #tpu.pipeline_mode<synchronous>, transform_indices = @transform_2, window_bounds = array<i64: 1, 2>}, {pipeline_mode = #tpu.pipeline_mode<synchronous>, transform_indices = @transform_3, window_bounds = array<i64: 2, 32>}, {pipeline_mode = #tpu.pipeline_mode<synchronous>, transform_indices = @transform_4, window_bounds = array<i64: 1, 32>}, {pipeline_mode = #tpu.pipeline_mode<synchronous>, transform_indices = @transform_5, window_bounds = array<i64: 36, 36>}, {pipeline_mode = #tpu.pipeline_mode<synchronous>, transform_indices = @transform_6, window_bounds = array<i64: 36, 36>}, {transform_indices = @transform_7, window_bounds = array<i64: 1>}, {transform_indices = @transform_8, window_bounds = array<i64: 1, 36, 32>}]} {
    %c0 = arith.constant 0 : index
    %c0_0 = arith.constant 0 : index
    %c0_1 = arith.constant 0 : index
    %0 = vector.load %arg1[%c0, %c0_0, %c0_1] : memref<1x36x32xf32, #tpu.memory_space<vmem>>, vector<1x36x32xf32>
    %1 = vector.shape_cast %0 : vector<1x36x32xf32> to vector<36x32xf32>
    %cst = arith.constant dense<0.000000e+00> : vector<32xf32>
    %2 = vector.multi_reduction <add>, %1, %cst [0] : vector<36x32xf32> to vector<32xf32>
    %3 = vector.shape_cast %2 : vector<32xf32> to vector<1x32xf32>
    %cst_2 = arith.constant 3.600000e+01 : f32
    %4 = vector.broadcast %cst_2 : f32 to vector<1x32xf32>
    %5 = arith.divf %3, %4 : vector<1x32xf32>
    %cst_3 = arith.constant dense<0xFF800000> : vector<32xf32>
    %6 = vector.multi_reduction <maximumf>, %1, %cst_3 [0] : vector<36x32xf32> to vector<32xf32>
    %7 = vector.shape_cast %6 : vector<32xf32> to vector<1x32xf32>
    %8 = tpu.concatenate %5, %7 in 0 : vector<1x32xf32>, vector<1x32xf32> -> vector<2x32xf32>
    %c0_4 = arith.constant 0 : index
    %c0_5 = arith.constant 0 : index
    %9 = vector.load %arg2[%c0_4, %c0_5] : memref<32x2xf32, #tpu.memory_space<vmem>>, vector<32x2xf32>
    %cst_6 = arith.constant dense<0.000000e+00> : vector<2x2xf32>
    %10 = tpu.matmul %8, %9, %cst_6 {dimension_numbers = #tpu.dot_dimension_numbers<[1], [0], [0], [1], [0, 0, 1, 1], [], []>} : vector<2x32xf32>, vector<32x2xf32>, vector<2x2xf32> -> vector<2x2xf32>
    %c0_7 = arith.constant 0 : index
    %c0_8 = arith.constant 0 : index
    %11 = vector.load %arg3[%c0_7, %c0_8] : memref<1x2xf32, #tpu.memory_space<vmem>>, vector<1x2xf32>
    %12 = vector.broadcast %11 : vector<1x2xf32> to vector<2x2xf32>
    %13 = arith.addf %10, %12 : vector<2x2xf32>
    %cst_9 = arith.constant 0.000000e+00 : f32
    %14 = vector.broadcast %cst_9 : f32 to vector<2x2xf32>
    %15 = arith.maximumf %13, %14 : vector<2x2xf32>
    %c0_10 = arith.constant 0 : index
    %c0_11 = arith.constant 0 : index
    %16 = vector.load %arg4[%c0_10, %c0_11] : memref<2x32xf32, #tpu.memory_space<vmem>>, vector<2x32xf32>
    %cst_12 = arith.constant dense<0.000000e+00> : vector<2x32xf32>
    %17 = tpu.matmul %15, %16, %cst_12 {dimension_numbers = #tpu.dot_dimension_numbers<[1], [0], [0], [1], [0, 0, 1, 1], [], []>} : vector<2x2xf32>, vector<2x32xf32>, vector<2x32xf32> -> vector<2x32xf32>
    %c0_13 = arith.constant 0 : index
    %c0_14 = arith.constant 0 : index
    %18 = vector.load %arg5[%c0_13, %c0_14] : memref<1x32xf32, #tpu.memory_space<vmem>>, vector<1x32xf32>
    %19 = vector.broadcast %18 : vector<1x32xf32> to vector<2x32xf32>
    %20 = arith.addf %17, %19 : vector<2x32xf32>
    %cst_15 = arith.constant dense<0.000000e+00> : vector<32xf32>
    %21 = vector.multi_reduction <add>, %20, %cst_15 [0] : vector<2x32xf32> to vector<32xf32>
    %22 = vector.shape_cast %21 : vector<32xf32> to vector<1x32xf32>
    %23 = arith.negf %22 : vector<1x32xf32>
    %24 = math.exp %23 : vector<1x32xf32>
    %cst_16 = arith.constant 1.000000e+00 : f32
    %25 = vector.broadcast %cst_16 : f32 to vector<1x32xf32>
    %26 = arith.addf %25, %24 : vector<1x32xf32>
    %27 = arith.divf %25, %26 : vector<1x32xf32>
    %28 = vector.broadcast %27 : vector<1x32xf32> to vector<36x32xf32>
    %29 = arith.mulf %1, %28 : vector<36x32xf32>
    %cst_17 = arith.constant dense<0.000000e+00> : vector<36xf32>
    %30 = vector.multi_reduction <add>, %29, %cst_17 [1] : vector<36x32xf32> to vector<36xf32>
    %31 = vector.shape_cast %30 : vector<36xf32> to vector<36x1xf32>
    %cst_18 = arith.constant 3.200000e+01 : f32
    %32 = vector.broadcast %cst_18 : f32 to vector<36x1xf32>
    %33 = arith.divf %31, %32 : vector<36x1xf32>
    %cst_19 = arith.constant dense<0xFF800000> : vector<36xf32>
    %34 = vector.multi_reduction <maximumf>, %29, %cst_19 [1] : vector<36x32xf32> to vector<36xf32>
    %35 = vector.shape_cast %34 : vector<36xf32> to vector<36x1xf32>
    %c0_20 = arith.constant 0 : index
    %c0_21 = arith.constant 0 : index
    %36 = vector.load %arg6[%c0_20, %c0_21] : memref<36x36xf32, #tpu.memory_space<vmem>>, vector<36x36xf32>
    %cst_22 = arith.constant dense<0.000000e+00> : vector<36x1xf32>
    %37 = tpu.matmul %36, %33, %cst_22 {dimension_numbers = #tpu.dot_dimension_numbers<[1], [0], [0], [1], [0, 0, 1, 1], [], []>} : vector<36x36xf32>, vector<36x1xf32>, vector<36x1xf32> -> vector<36x1xf32>
    %c0_23 = arith.constant 0 : index
    %c0_24 = arith.constant 0 : index
    %38 = vector.load %arg7[%c0_23, %c0_24] : memref<36x36xf32, #tpu.memory_space<vmem>>, vector<36x36xf32>
    %cst_25 = arith.constant dense<0.000000e+00> : vector<36x1xf32>
    %39 = tpu.matmul %38, %35, %cst_25 {dimension_numbers = #tpu.dot_dimension_numbers<[1], [0], [0], [1], [0, 0, 1, 1], [], []>} : vector<36x36xf32>, vector<36x1xf32>, vector<36x1xf32> -> vector<36x1xf32>
    %40 = arith.addf %37, %39 : vector<36x1xf32>
    %c0_26 = arith.constant 0 : index
    %41 = memref.load %arg8[%c0_26] : memref<1xf32, #tpu.memory_space<smem>>
    %42 = vector.broadcast %41 : f32 to vector<36x1xf32>
    %43 = arith.addf %40, %42 : vector<36x1xf32>
    %44 = arith.negf %43 : vector<36x1xf32>
    %45 = math.exp %44 : vector<36x1xf32>
    %cst_27 = arith.constant 1.000000e+00 : f32
    %46 = vector.broadcast %cst_27 : f32 to vector<36x1xf32>
    %47 = arith.addf %46, %45 : vector<36x1xf32>
    %48 = arith.divf %46, %47 : vector<36x1xf32>
    %49 = vector.broadcast %48 : vector<36x1xf32> to vector<36x32xf32>
    %50 = arith.mulf %29, %49 : vector<36x32xf32>
    %c0_28 = arith.constant 0 : index
    %c0_29 = arith.constant 0 : index
    %c0_30 = arith.constant 0 : index
    %51 = vector.load %arg9[%c0_28, %c0_29, %c0_30] : memref<1x36x32xf32, #tpu.memory_space<vmem>>, vector<1x36x32xf32>
    %52 = vector.shape_cast %51 : vector<1x36x32xf32> to vector<36x32xf32>
    %53 = vector.shape_cast %50 : vector<36x32xf32> to vector<1x36x32xf32>
    tpu.vector_store %arg9[%c0_28, %c0_29, %c0_30], %53 {strides = array<i32>} : memref<1x36x32xf32, #tpu.memory_space<vmem>>, vector<1x36x32xf32>,
    return
  }
  func.func @transform_0(%arg0: i32) -> (i32, i32, i32) {
    %c0_i32 = arith.constant 0 : i32
    %c0_i32_0 = arith.constant 0 : i32
    %c0_i32_1 = arith.constant 0 : i32
    return %arg0, %c0_i32, %c0_i32_0 : i32, i32, i32
  }
  func.func @transform_1(%arg0: i32) -> (i32, i32) {
    %c0_i32 = arith.constant 0 : i32
    %c0_i32_0 = arith.constant 0 : i32
    %c0_i32_1 = arith.constant 0 : i32
    return %c0_i32, %c0_i32_0 : i32, i32
  }
  func.func @transform_2(%arg0: i32) -> (i32, i32) {
    %c0_i32 = arith.constant 0 : i32
    %c0_i32_0 = arith.constant 0 : i32
    %c0_i32_1 = arith.constant 0 : i32
    return %c0_i32, %c0_i32_0 : i32, i32
  }
  func.func @transform_3(%arg0: i32) -> (i32, i32) {
    %c0_i32 = arith.constant 0 : i32
    %c0_i32_0 = arith.constant 0 : i32
    %c0_i32_1 = arith.constant 0 : i32
    return %c0_i32, %c0_i32_0 : i32, i32
  }
  func.func @transform_4(%arg0: i32) -> (i32, i32) {
    %c0_i32 = arith.constant 0 : i32
    %c0_i32_0 = arith.constant 0 : i32
    %c0_i32_1 = arith.constant 0 : i32
    return %c0_i32, %c0_i32_0 : i32, i32
  }
  func.func @transform_5(%arg0: i32) -> (i32, i32) {
    %c0_i32 = arith.constant 0 : i32
    %c0_i32_0 = arith.constant 0 : i32
    %c0_i32_1 = arith.constant 0 : i32
    return %c0_i32, %c0_i32_0 : i32, i32
  }
  func.func @transform_6(%arg0: i32) -> (i32, i32) {
    %c0_i32 = arith.constant 0 : i32
    %c0_i32_0 = arith.constant 0 : i32
    %c0_i32_1 = arith.constant 0 : i32
    return %c0_i32, %c0_i32_0 : i32, i32
  }
  func.func @transform_7(%arg0: i32) -> i32 {
    %c0_i32 = arith.constant 0 : i32
    %c0_i32_0 = arith.constant 0 : i32
    return %c0_i32 : i32
  }
  func.func @transform_8(%arg0: i32) -> (i32, i32, i32) {
    %c0_i32 = arith.constant 0 : i32
    %c0_i32_0 = arith.constant 0 : i32
    %c0_i32_1 = arith.constant 0 : i32
    return %arg0, %c0_i32, %c0_i32_0 : i32, i32, i32
  }
}

module attributes {stable_mosaic.version = 11 : i64} {
  func.func @_convt3s1_tanh_kernel(%arg0: i32, %arg1: memref<3x288xbf16, #tpu.memory_space<vmem>>, %arg2: memref<1x288x36xbf16, #tpu.memory_space<vmem>>, %arg3: memref<1x3x36xf32, #tpu.memory_space<vmem>>) attributes {dimension_semantics = [#tpu.dimension_semantics<parallel>], iteration_bounds = array<i64: 2>, scalar_prefetch = 0 : i64, scratch_operands = 0 : i64, tpu.core_type = #tpu.core_type<tc>, window_params = [{pipeline_mode = #tpu.pipeline_mode<synchronous>, transform_indices = @transform_0, window_bounds = array<i64: 3, 288>}, {transform_indices = @transform_1, window_bounds = array<i64: 1, 288, 36>}, {transform_indices = @transform_2, window_bounds = array<i64: 1, 3, 36>}]} {
    %c0 = arith.constant 0 : index
    %c0_0 = arith.constant 0 : index
    %0 = vector.load %arg1[%c0, %c0_0] : memref<3x288xbf16, #tpu.memory_space<vmem>>, vector<3x288xbf16>
    %c0_1 = arith.constant 0 : index
    %c0_2 = arith.constant 0 : index
    %c0_3 = arith.constant 0 : index
    %1 = vector.load %arg2[%c0_1, %c0_2, %c0_3] : memref<1x288x36xbf16, #tpu.memory_space<vmem>>, vector<1x288x36xbf16>
    %2 = vector.shape_cast %1 : vector<1x288x36xbf16> to vector<288x36xbf16>
    %cst = arith.constant dense<0.000000e+00> : vector<3x36xf32>
    %3 = tpu.matmul %0, %2, %cst {dimension_numbers = #tpu.dot_dimension_numbers<[1], [0], [0], [1], [0, 0, 1, 1], [], []>} : vector<3x288xbf16>, vector<288x36xbf16>, vector<3x36xf32> -> vector<3x36xf32>
    %4 = math.tanh %3 : vector<3x36xf32>
    %c0_4 = arith.constant 0 : index
    %c0_5 = arith.constant 0 : index
    %c0_6 = arith.constant 0 : index
    %5 = vector.load %arg3[%c0_4, %c0_5, %c0_6] : memref<1x3x36xf32, #tpu.memory_space<vmem>>, vector<1x3x36xf32>
    %6 = vector.shape_cast %5 : vector<1x3x36xf32> to vector<3x36xf32>
    %7 = vector.shape_cast %4 : vector<3x36xf32> to vector<1x3x36xf32>
    tpu.vector_store %arg3[%c0_4, %c0_5, %c0_6], %7 {strides = array<i32>} : memref<1x3x36xf32, #tpu.memory_space<vmem>>, vector<1x3x36xf32>,
    return
  }
  func.func @transform_0(%arg0: i32) -> (i32, i32) {
    %c0_i32 = arith.constant 0 : i32
    %c0_i32_0 = arith.constant 0 : i32
    %c0_i32_1 = arith.constant 0 : i32
    return %c0_i32, %c0_i32_0 : i32, i32
  }
  func.func @transform_1(%arg0: i32) -> (i32, i32, i32) {
    %c0_i32 = arith.constant 0 : i32
    %c0_i32_0 = arith.constant 0 : i32
    %c0_i32_1 = arith.constant 0 : i32
    return %arg0, %c0_i32, %c0_i32_0 : i32, i32, i32
  }
  func.func @transform_2(%arg0: i32) -> (i32, i32, i32) {
    %c0_i32 = arith.constant 0 : i32
    %c0_i32_0 = arith.constant 0 : i32
    %c0_i32_1 = arith.constant 0 : i32
    return %arg0, %c0_i32, %c0_i32_0 : i32, i32, i32
  }
}

</mosaic_0001>

<bundles_post_ra>
// kernel: squeeze.35
= control target key start
LH: loop header
LB: loop body
LE: loop exit
PB: predicated region body
PF: predicated region fallthrough
CT: control target
= control target key end

     0   :  { %s61_s10 = smov 42   ;;  %s62_s11 = smov 28   ;;  %vm3_vm0 = vcmask 56320   ;;  %vm9_vm1 = vcmask 400720   ;;  %vm15_vm2 = vcmask 343320   ;;  %vm21_vm3 = vcmask 285920   ;;  %s101_s0 = inlined_call_operand.vmem [shape: f32[7,7], index: 0, kind: input, shape index: {}]   ;;  %s102_s1 = inlined_call_operand.vmem [shape: f32[49], index: 1, kind: output, shape index: {}]  }
   0x1   :  { %v49_v0 = vld [vmem:[%s101_s0 + $0x6] sm:$0x1]   ;;  %v51_v1 = vld [vmem:[%s101_s0 + $0x4] sm:$0x1]   ;;  %v50_v2 = vld [vmem:[%s101_s0 + $0x5] sm:$0x1]  }
   0x2   :  { %7 = vrot.lane.b32.xlu0 %v49_v0, %s61_s10  ;;  %19 = vrot.lane.b32.xlu1 %v51_v1, %s62_s11  ;;  %v52_v3 = vld [vmem:[%s101_s0 + $0x3] sm:$0x1]   ;;  %v2_v4 = vld [vmem:[%s101_s0] sm:$0x1]   ;;  %s63_s18 = smov 35   ;;  %s64_s19 = smov 21  }
   0x3   :  { %4 = vst.msk [vmem:[#allocation0] sm:$0x1] %vm3_vm0, %v2_v4   ;;  %v53_v5 = vld [vmem:[%s101_s0 + $0x2] sm:$0x1]   ;;  %v54_v6 = vld [vmem:[%s101_s0 + $0x1] sm:$0x1]  }
   0x4   :  { %s65_s0 = smov 14   ;;  %s66_s24 = smov 7   ;;  %vm27_vm4 = vcmask 228520   ;;  %vm33_vm5 = vcmask 171120   ;;  %vm39_vm6 = vcmask 113720  }
   0x6   :  { %13 = vrot.lane.b32.xlu0 %v50_v2, %s63_s18  ;;  %25 = vrot.lane.b32.xlu1 %v52_v3, %s64_s19 }
   0xa   :  { %31 = vrot.lane.b32.xlu0 %v53_v5, %s65_s0  ;;  %37 = vrot.lane.b32.xlu1 %v54_v6, %s66_s24 }
  0x74   :  { %v8_v7 = vpop.permute.xlu0 %7   ;;  %v20_v8 = vpop.permute.xlu1 %19  }
  0x75   :  { %10 = vst.msk [vmem:[#allocation0] sm:$0x1] %vm9_vm1, %v8_v7  }
  0x78   :  { %v14_v9 = vpop.permute.xlu0 %13   ;;  %v26_v10 = vpop.permute.xlu1 %25  }
  0x79   :  { %16 = vst.msk [vmem:[#allocation0] sm:$0x1] %vm15_vm2, %v14_v9  }
  0x7a   :  { %22 = vst.msk [vmem:[#allocation0] sm:$0x1] %vm21_vm3, %v20_v8  }
  0x7b   :  { %28 = vst.msk [vmem:[#allocation0] sm:$0x1] %vm27_vm4, %v26_v10  }
  0x7c   :  { %v32_v11 = vpop.permute.xlu0 %31   ;;  %v38_v12 = vpop.permute.xlu1 %37  }
  0x7d   :  { %34 = vst.msk [vmem:[#allocation0] sm:$0x1] %vm33_vm5, %v32_v11  }
  0x7e   :  { %40 = vst.msk [vmem:[#allocation0] sm:$0x1] %vm39_vm6, %v38_v12  }
  0x85   :  { %v45_v13 = vld [vmem:[#allocation0] sm:$0x1] }
  0x86   :  { %48 = vst [vmem:[%s102_s1] sm:$0x1] %v45_v13 }

// kernel: tile.23
= control target key start
LH: loop header
LB: loop body
LE: loop exit
PB: predicated region body
PF: predicated region fallthrough
CT: control target
= control target key end

     0   :  { %s28_s0 = inlined_call_operand.vmem [shape: f32[64], index: 0, kind: input, shape index: {}]   ;;  %s29_s1 = inlined_call_operand.vmem [shape: f32[9,64], index: 1, kind: output, shape index: {}]  }
   0x1   :  { %v4_v0 = vld [vmem:[%s28_s0] ss:$0 sm:$0xff] }
   0x2   :  { %5 = vst [vmem:[%s29_s1] sm:$0xff] %v4_v0  ;;  %8 = vst [vmem:[%s29_s1 + $0x8] sm:$0xff] %v4_v0 }

// kernel: tile.28
= control target key start
LH: loop header
LB: loop body
LE: loop exit
PB: predicated region body
PF: predicated region fallthrough
CT: control target
= control target key end

     0   :  { %vm3_vm0 = vcmask 523264   ;;  %s57_s8 = smov 64   ;;  %vm11_vm1 = vcmask 1048064   ;;  %s89_s0 = inlined_call_operand.vmem [shape: f32[9,64], index: 0, kind: input, shape index: {}]   ;;  %s90_s1 = inlined_call_operand.vmem [shape: f32[1,576], index: 1, kind: output, shape index: {}]  }
   0x1   :  { %v51_v0 = vld [vmem:[%s89_s0 + $0x1] ss:$2 sm:$0xf]   ;;  %v2_v1 = vld [vmem:[%s89_s0] ss:$2 sm:$0x1f]  }
   0x2   :  { %9 = vrot.lane.b32.xlu0 %v51_v0, %s57_s8  ;;  %4 = vst.msk [vmem:[#allocation0] ss:$8 sm:$0xf] %vm3_vm0, %v2_v1   ;;  %6 = vst.msk [vmem:[#allocation0 + $0x1c] sm:$0x10] %vm3_vm0, %v2_v1  }
   0x9   :  { %v42_v2 = vld [vmem:[#allocation0 + $0x20] sm:$0x1] }
   0xa   :  { %55 = vst [vmem:[%s90_s1 + $0x4] sm:$0x1] %v42_v2 }
  0x74   :  { %v10_v3 = vpop.permute.xlu0 %9  }
  0x75   :  { %12 = vst.msk [vmem:[#allocation0] ss:$8 sm:$0xf] %vm11_vm1, %v10_v3  }
  0x7c   :  { %v17_v4 = vld [vmem:[#allocation0] sm:$0x1]  ;;  %v22_v5 = vld [vmem:[#allocation0 + $0x8] sm:$0x1]  ;;  %v28_v6 = vld [vmem:[#allocation0 + $0x10] sm:$0x1] }
  0x7d   :  { %20 = vst [vmem:[%s90_s1] sm:$0x1] %v17_v4  ;;  %52 = vst [vmem:[%s90_s1 + $0x1] sm:$0x1] %v22_v5  ;;  %v35_v7 = vld [vmem:[#allocation0 + $0x18] sm:$0x1] }
  0x7e   :  { %53 = vst [vmem:[%s90_s1 + $0x2] sm:$0x1] %v28_v6  ;;  %54 = vst [vmem:[%s90_s1 + $0x3] sm:$0x1] %v35_v7 }

// kernel: tile.33
= control target key start
LH: loop header
LB: loop body
LE: loop exit
PB: predicated region body
PF: predicated region fallthrough
CT: control target
= control target key end

     0   :  { %s22_s0 = inlined_call_operand.vmem [shape: f32[32], index: 0, kind: input, shape index: {}]   ;;  %s23_s1 = inlined_call_operand.vmem [shape: f32[4,32], index: 1, kind: output, shape index: {}]  }
   0x1   :  { %v4_v0 = vld [vmem:[%s22_s0] ss:$0 sm:$0xff] }
   0x2   :  { %5 = vst [vmem:[%s23_s1] sm:$0xf] %v4_v0 }

// kernel: tile.38
= control target key start
LH: loop header
LB: loop body
LE: loop exit
PB: predicated region body
PF: predicated region fallthrough
CT: control target
= control target key end

     0   :  { %vm8_vm0 = vcmask 261120   ;;  %s40_s8 = smov 32   ;;  %s41_s9 = smov 64   ;;  %vm14_vm1 = vcmask 1048320   ;;  %vm20_vm2 = vcmask 785920   ;;  %vm26_vm3 = vcmask 523520   ;;  %s58_s0 = inlined_call_operand.vmem [shape: f32[4,32], index: 0, kind: input, shape index: {}]   ;;  %s59_s1 = inlined_call_operand.vmem [shape: f32[1,128], index: 1, kind: output, shape index: {}]  }
   0x1   :  { %v5_v0 = vld [vmem:[%s58_s0] sm:$0xf]  ;;  %s39_s0 = smov 96  }
   0x2   :  { %6 = vst [vmem:[#allocation1] sm:$0xf] %v5_v0 }
   0x9   :  { %v11_v1 = vld [vmem:[#allocation1 + $0x3] sm:$0x1]   ;;  %v23_v2 = vld [vmem:[#allocation1 + $0x1] sm:$0x1]   ;;  %v7_v3 = vld [vmem:[#allocation1] sm:$0x1]  }
   0xa   :  { %12 = vrot.lane.b32.xlu0 %v11_v1, %s39_s0  ;;  %24 = vrot.lane.b32.xlu1 %v23_v2, %s40_s8  ;;  %v17_v4 = vld [vmem:[#allocation1 + $0x2] sm:$0x1]   ;;  %9 = vst.msk [vmem:[#allocation0] sm:$0x1] %vm8_vm0, %v7_v3  }
   0xe   :  { %18 = vrot.lane.b32.xlu0 %v17_v4, %s41_s9 }
  0x7c   :  { %v13_v5 = vpop.permute.xlu0 %12   ;;  %v25_v6 = vpop.permute.xlu1 %24  }
  0x7d   :  { %15 = vst.msk [vmem:[#allocation0] sm:$0x1] %vm14_vm1, %v13_v5  }
  0x80   :  { %v19_v7 = vpop.permute.xlu0 %18  }
  0x81   :  { %21 = vst.msk [vmem:[#allocation0] sm:$0x1] %vm20_vm2, %v19_v7  }
  0x82   :  { %27 = vst.msk [vmem:[#allocation0] sm:$0x1] %vm26_vm3, %v25_v6  }
  0x89   :  { %v32_v8 = vld [vmem:[#allocation0] sm:$0x1] }
  0x8a   :  { %35 = vst [vmem:[%s59_s1] sm:$0x1] %v32_v8 }

// kernel: decoder_forward_pallas.5
= control target key start
LH: loop header
LB: loop body
LE: loop exit
PB: predicated region body
PF: predicated region fallthrough
CT: control target
= control target key end

     0   :  { %v383_v3 = vmov 0.0   ;;  %vm38_vm0 = vcmask 261120   ;;  %vm384_vm1 = vmmov 0   ;;  %v256_v22 = vlaneseq  ;;  %s489_s1 = inlined_call_operand.vmem [shape: f32[32,576], index: 1, kind: input, shape index: {}]   ;;  %s490_s0 = inlined_call_operand.vmem [shape: f32[2,32], index: 0, kind: input, shape index: {}]   ;;  %s491_s2 = inlined_call_operand.vmem [shape: f32[1,576], index: 2, kind: input, shape index: {}]   ;;  %s492_s3 = inlined_call_operand.vmem [shape: f32[1,576], index: 3, kind: input, shape index: {}]   ;;  %s493_s4 = inlined_call_operand.vmem [shape: f32[2,576], index: 4, kind: output, shape index: {}]  }
   0x1   :  { %v34_v0 = vld [vmem:[%s489_s1 + $0x80] sm:$0xff]  ;;  %v36_v1 = vld [vmem:[%s489_s1 + $0x90] sm:$0xff]  ;;  %v33_v2 = vld [vmem:[%s489_s1 + $0x78] sm:$0xff]  ;;  %106 = vmatprep.mubr.f32.mxu0 %v383_v3  ;;  %177 = vmatprep.mubr.f32.mxu1 %v383_v3  ;;  %v385_v32 = vmov 1983009808   ;;  %vm355_vm2 = vcmask 517120  }
   0x2   :  { %66 = vmatprep.subr.mxu0 %v34_v0  ;;  %137 = vmatprep.subr.mxu1 %v36_v1  ;;  %v35_v4 = vld [vmem:[%s489_s1 + $0x88] sm:$0xff]  ;;  %v29_v5 = vld [vmem:[%s489_s1 + $0x58] sm:$0xff]  ;;  %v28_v7 = vld [vmem:[%s489_s1 + $0x50] sm:$0xff]  ;;  %v257_v23 = vshrl.u32 %v256_v22, 7  ;;  %v331_v33 = vunpack.c.l.s4 %v385_v32 }
   0x3   :  { %v31_v6 = vld [vmem:[%s489_s1 + $0x68] sm:$0xff]  ;;  %67 = vmatpush1.msra.mxu0 %v33_v2  ;;  %138 = vmatpush1.msra.mxu1 %v35_v4  ;;  %v30_v8 = vld [vmem:[%s489_s1 + $0x60] sm:$0xff]  ;;  %v24_v9 = vld [vmem:[%s489_s1 + $0x30] sm:$0xff] }
   0x4   :  { %68 = vmatprep.subr.mxu0 %v29_v5  ;;  %139 = vmatprep.subr.mxu1 %v31_v6  ;;  %v26_v10 = vld [vmem:[%s489_s1 + $0x40] sm:$0xff]  ;;  %v23_v11 = vld [vmem:[%s489_s1 + $0x28] sm:$0xff]  ;;  %v25_v12 = vld [vmem:[%s489_s1 + $0x38] sm:$0xff]  ;;  %v258_v24 = vsub.s32 0, %v257_v23  ;;  %v266_v25 = vsub.s32 2, %v257_v23  ;;  %v262_v27 = vsub.s32 1, %v257_v23  ;;  %v332_v45 = vunpack.c.0.s8 %v331_v33 }
   0x5   :  { %69 = vmatpush1.msra.mxu0 %v28_v7  ;;  %140 = vmatpush1.msra.mxu1 %v30_v8  ;;  %v19_v13 = vld [vmem:[%s489_s1 + $0x8] sm:$0xff]  ;;  %v21_v14 = vld [vmem:[%s489_s1 + $0x18] sm:$0xff]  ;;  %v18_v15 = vld [vmem:[%s489_s1] sm:$0xff]  ;;  %v270_v28 = vsub.s32 3, %v257_v23  ;;  %v274_v47 = vsub.s32 4, %v257_v23 }
   0x6   :  { %70 = vmatprep.subr.mxu0 %v24_v9  ;;  %141 = vmatprep.subr.mxu1 %v26_v10  ;;  %v20_v16 = vld [vmem:[%s489_s1 + $0x10] sm:$0xff]  ;;  %v17_v17 = vld [vmem:[%s490_s0] sm:$0x3]  ;;  %v37_v18 = vld [vmem:[%s489_s1 + $0x98] sm:$0xff]  ;;  %v335_v58 = vsub.s32 %v332_v45, %v257_v23 }
   0x7   :  { %71 = vmatpush1.msra.mxu0 %v23_v11  ;;  %142 = vmatpush1.msra.mxu1 %v25_v12  ;;  %v32_v19 = vld [vmem:[%s489_s1 + $0x70] sm:$0xff]  ;;  %v27_v20 = vld [vmem:[%s489_s1 + $0x48] sm:$0xff]  ;;  %v22_v21 = vld [vmem:[%s489_s1 + $0x20] sm:$0xff] }
   0x8   :  { %72 = vmatprep.subr.mxu0 %v19_v13  ;;  %143 = vmatprep.subr.mxu1 %v21_v14  ;;  %v254_v26 = vld [vmem:[%s491_s2] sm:$0x1f] }
   0x9   :  { %73 = vmatpush1.msra.mxu0 %v18_v15  ;;  %144 = vmatpush1.msra.mxu1 %v20_v16  ;;  %v286_v29 = vld [vmem:[%s492_s3] sm:$0x1f]  ;;  %v259_v30 = vrot.slane %v254_v26, %v258_v24  ;;  %v267_v31 = vrot.slane %v254_v26, %v266_v25  ;;  %v263_v36 = vrot.slane %v254_v26, %v262_v27 }
   0xa   :  { %361 = vmatmul.mubr.msk.f32.vlgmr.msra.gmra.mxu0 %vm38_vm0, %v17_v17  ;;  %362 = vmatmul.mubr.msk.f32.vlgmr.msra.gmra.mxu1 %vm38_vm0, %v17_v17  ;;  %v291_v34 = vrot.slane %v286_v29, %v258_v24  ;;  %v299_v35 = vrot.slane %v286_v29, %v266_v25  ;;  %v271_v37 = vrot.slane %v254_v26, %v270_v28 }
   0xb   :  { %369 = vmatprep.subr.mxu0 %v383_v3  ;;  %377 = vmatprep.mubr.msk.f32.mxu0 %vm384_vm1, %v383_v3  ;;  %v295_v42 = vrot.slane %v286_v29, %v262_v27  ;;  %v303_v43 = vrot.slane %v286_v29, %v270_v28  ;;  %v275_v56 = vrot.slane %v254_v26, %v274_v47 }
   0xc   :  { %370 = vmatpush3.msra.mxu0 %v37_v18  ;;  %v307_v60 = vrot.slane %v286_v29, %v274_v47 }
   0xd   :  { %371 = vmatprep.subr.mxu0 %v383_v3 }
   0xe   :  { %372 = vmatpush3.msra.mxu0 %v32_v19 }
   0xf   :  { %373 = vmatprep.subr.mxu0 %v383_v3 }
  0x10   :  { %374 = vmatpush3.msra.mxu0 %v27_v20 }
  0x11   :  { %375 = vmatprep.subr.mxu0 %v383_v3 }
  0x12   :  { %376 = vmatpush3.msra.mxu0 %v22_v21 }
  0x13   :  { %378 = vmatmul.mubr.msk.f32.vlgmr.msra.gmra.mxu0 %vm38_vm0, %v17_v17 }
  0xca   :  { %v108_v38 = vpop.f32.mrf.mxu0  ;;  %v179_v39 = vpop.f32.mrf.mxu1 }
  0xcb   :  { %v281_v40 = vmul.f32 %v259_v30, %v108_v38  ;;  %v283_v41 = vmul.f32 %v267_v31, %v179_v39 }
  0xcc   :  { %v110_v44 = vpop.f32.mrf.mxu0  ;;  %v181_v46 = vpop.f32.mrf.mxu1 }
  0xcd   :  { %v313_v48 = vadd.f32 %v291_v34, %v281_v40  ;;  %v315_v49 = vadd.f32 %v299_v35, %v283_v41  ;;  %v282_v50 = vmul.f32 %v263_v36, %v110_v44  ;;  %v284_v51 = vmul.f32 %v271_v37, %v181_v46 }
  0xcf   :  { %v318_v52 = vmax.f32 %v313_v48, 0.0  ;;  %v320_v53 = vmax.f32 %v315_v49, 0.0  ;;  %v314_v54 = vadd.f32 %v295_v42, %v282_v50  ;;  %v316_v55 = vadd.f32 %v303_v43, %v284_v51 }
  0xd1   :  { %v319_v57 = vmax.f32 %v314_v54, 0.0  ;;  %v321_v59 = vmax.f32 %v316_v55, 0.0 }
  0xd3   :  { %v328_v61 = vcombine.low %v318_v52, %v319_v57  ;;  %v329_v62 = vcombine.low %v320_v53, %v321_v59  ;;  %v250_v63 = vpop.f32.mrf.mxu0 }
  0xd4   :  { %v285_v0 = vmul.f32 %v275_v56, %v250_v63 }
  0xd5   :  { %v336_v1 = vrot.slane %v328_v61, %v335_v58  ;;  %v343_v2 = vrot.slane %v329_v62, %v335_v58  ;;  %v379_v3 = vpop.f32.mrf.mxu0 }
  0xd6   :  { %v317_v4 = vadd.f32 %v307_v60, %v285_v0 }
  0xd7   :  { %v344_v5 = vcombine.low %v336_v1, %v343_v2 }
  0xd8   :  { %v322_v6 = vmax.f32 %v317_v4, 0.0 }
  0xd9   :  { %354 = vst [vmem:[%s493_s4] sm:$0xff] %v344_v5 }
  0xda   :  { %v351_v7 = vrot.slane %v322_v6, %v335_v58 }
  0xdc   :  { %356 = vst.msk [vmem:[%s493_s4 + $0x8] sm:$0x3] %vm355_vm2, %v351_v7 }

// kernel: decoder_forward_pallas.6
= control target key start
LH: loop header
LB: loop body
LE: loop exit
PB: predicated region body
PF: predicated region fallthrough
CT: control target
= control target key end

     0   :  { %s965_s29 = smov 0   ;;  %s1069_s0 = inlined_call_operand.vmem [shape: f32[2,9,64], index: 0, kind: input, shape index: {}]   ;;  %s1070_s1 = inlined_call_operand.vmem [shape: f32[64,4], index: 1, kind: input, shape index: {}]   ;;  %s1071_s2 = inlined_call_operand.vmem [shape: f32[1,4], index: 2, kind: input, shape index: {}]   ;;  %s1072_s3 = inlined_call_operand.vmem [shape: f32[4,64], index: 3, kind: input, shape index: {}]   ;;  %s1073_s4 = inlined_call_operand.vmem [shape: f32[1,64], index: 4, kind: input, shape index: {}]   ;;  %s1074_s5 = inlined_call_operand.vmem [shape: f32[9,9], index: 5, kind: input, shape index: {}]   ;;  %s1075_s6 = inlined_call_operand.vmem [shape: f32[9,9], index: 6, kind: input, shape index: {}]   ;;  %s1076_s7 = inlined_call_operand.<no memory space> [shape: f32[1], index: 7, kind: input, shape index: {}]   ;;  %s1077_s8 = inlined_call_operand.vmem [shape: f32[2,9,64], index: 8, kind: output, shape index: {}]  }
   0x1   :  { %13 = sst [smem:[#allocation2]] %s1076_s7 }
   0x2 LB: > { %s797_s30 = sadd.s32 4294967295, %s912_s29   ;;  %p801_p0 = scmp.ge.s32.totalorder %s912_s29, 1  ;;  %s912_s29 = sphi %s965_s29, %s19_s29  }
   0x3   : > { %p263_p1 = scmp.lt.s32.totalorder %s912_s29, 3 }
   0x5   : > { %p264_p2 = pnand %p801_p0, %p263_p1 }
   0x6   : > { %p297_p3 = scmp.lt.s32.totalorder (!%p264_p2), %s797_s30, 1  ;;  %s712_s22 = sld [smem:[#allocation2]] (!%p264_p2) }
   0x7   : > { %267 = sbr.rel (%p264_p2) target bundleno = 980 (0x3d4), region = 52 }
   0xc   : > { %v340_v0 = vld [vmem:[%s1070_s1 + $0x38] sm:$0xff]  ;;  %v914_v1 = vmov 0.0   ;;  %v339_v2 = vld [vmem:[%s1070_s1 + $0x30] sm:$0xff]  ;;  %vm915_vm0 = vmmov 0   ;;  %s1079_s30 = smov (!%p297_p3, %s797_s30), 1  ;;  %v338_v3 = vld [vmem:[%s1070_s1 + $0x28] sm:$0xff] }
   0xd   : > { %843 = vmatprep.subr.mxu0 %v914_v1  ;;  %859 = vmatprep.mubr.msk.f32.mxu0 %vm915_vm0, %v914_v1  ;;  %s822_s14 = sshll.u32 %s1079_s30, 4  ;;  %vm309_vm1 = vcmask 523264   ;;  %vm311_vm2 = vcmask 516096   ;;  %v337_v4 = vld [vmem:[%s1070_s1 + $0x20] sm:$0xff]  ;;  %v336_v7 = vld [vmem:[%s1070_s1 + $0x18] sm:$0xff]  ;;  %v335_v14 = vld [vmem:[%s1070_s1 + $0x10] sm:$0xff] }
   0xe   : > { %844 = vmatpush3.msra.mxu0 %v340_v0  ;;  %862 = vmatprep.subr.mxu1 %v914_v1  ;;  %s301_s19 = scalar_lea.vmem %s1069_s0, %s822_s14  ;;  %v334_v17 = vld [vmem:[%s1070_s1 + $0x8] sm:$0xff]  ;;  %v333_v20 = vld [vmem:[%s1070_s1] sm:$0xff]  ;;  %vm331_vm3 = vcmask 1040384   ;;  %vm434_vm4 = vcmask 1043456   ;;  %vm430_vm5 = vcmask 31744   ;;  %vm508_vm6 = vcmask 517120   ;;  %s306_s25 = scalar_lea.vmem %s1077_s8, %s822_s14 }
   0xf   : > { %845 = vmatprep.subr.mxu0 %v914_v1  ;;  %864 = vmatprep.mubr.msk.f32.mxu1 %vm915_vm0, %v914_v1  ;;  %v993_v5 = vld [vmem:[%s301_s19] sm:$0xff]  ;;  %v995_v6 = vld [vmem:[%s301_s19 + $0x8] sm:$0x1]  ;;  %vm543_vm7 = vcmask 72704  }
  0x10   : > { %846 = vmatpush3.msra.mxu0 %v339_v2  ;;  %v310_v8 = vsel %vm309_vm1, %v993_v5, 0.0  ;;  %v312_v9 = vsel %vm311_vm2, %v995_v6, 0.0  ;;  %v322_v10 = vsel %vm309_vm1, %v993_v5, -inf  ;;  %v323_v11 = vsel %vm311_vm2, %v995_v6, -inf  ;;  %v422_v31 = vld [vmem:[%s1072_s3] sm:$0xf] }
  0x11   : > { %847 = vmatprep.subr.mxu0 %v914_v1  ;;  %v313_v12 = vadd.f32 %v312_v9, %v310_v8  ;;  %v324_v13 = vmax.f32 %v322_v10, %v323_v11  ;;  %863 = vmatpush3.msk.msra.mxu1 %vm434_vm4, %v422_v31  ;;  %v806_v32 = vld [vmem:[%s1071_s2] ss:$0 sm:$0xff]  ;;  %v542_v61 = vld [vmem:[%s1075_s6 + $0x8] sm:$0x1]  ;;  %v713_v8 = vstv %s712_s22 }
  0x12   : > { %848 = vmatpush3.msra.mxu0 %v338_v3  ;;  %v808_v37 = vld [vmem:[%s1073_s4] ss:$0 sm:$0xff]  ;;  %v540_v3 = vld [vmem:[%s1074_s5 + $0x8] sm:$0x1] }
  0x13   : > { %849 = vmatprep.subr.mxu0 %v914_v1  ;;  %v314_v15 = vrot.slane %v313_v12, 4  ;;  %v325_v16 = vrot.slane %v324_v13, 4  ;;  %v541_v58 = vld [vmem:[%s1075_s6] sm:$0xff] }
  0x14   : > { %850 = vmatpush3.msra.mxu0 %v337_v4  ;;  %v539_v62 = vld [vmem:[%s1074_s5] sm:$0xff]  ;;  %v916_v4 = vmov 0  }
  0x15   : > { %851 = vmatprep.subr.mxu0 %v914_v1  ;;  %v315_v18 = vadd.f32 %v314_v15, %v313_v12  ;;  %v326_v19 = vmax.f32 %v324_v13, %v325_v16  ;;  %893 = vset.pattern.permute.xlu1 %v916_v4 }
  0x16   : > { %852 = vmatpush3.msra.mxu0 %v336_v7  ;;  %892 = vset.pattern.permute.xlu0 %v916_v4 }
  0x17   : > { %853 = vmatprep.subr.mxu0 %v914_v1  ;;  %v316_v21 = vrot.slane %v315_v18, 2  ;;  %v327_v22 = vrot.slane %v326_v19, 2 }
  0x18   : > { %854 = vmatpush3.msra.mxu0 %v335_v14 }
  0x19   : > { %855 = vmatprep.subr.mxu0 %v914_v1  ;;  %v317_v23 = vadd.f32 %v316_v21, %v315_v18  ;;  %v328_v24 = vmax.f32 %v326_v19, %v327_v22 }
  0x1a   : > { %856 = vmatpush3.msra.mxu0 %v334_v17 }
  0x1b   : > { %857 = vmatprep.subr.mxu0 %v914_v1  ;;  %v318_v25 = vrot.slane %v317_v23, 1  ;;  %v329_v26 = vrot.slane %v328_v24, 1 }
  0x1c   : > { %858 = vmatpush3.msra.mxu0 %v333_v20 }
  0x1d   : > { %v319_v27 = vadd.f32 %v318_v25, %v317_v23  ;;  %v330_v28 = vmax.f32 %v328_v24, %v329_v26 }
  0x1f   : > { %v321_v29 = vmul.f32 0.11111111, %v319_v27 }
  0x21   : > { %v332_v30 = vsel %vm331_vm3, %v321_v29, %v330_v28 }
  0x22   : > { %860 = vmatmul.mubr.msk.f32.vlgmr.msra.gmra.mxu0 %vm309_vm1, %v332_v30 }
  0xe2   : > { %v417_v33 = vpop.f32.mrf.mxu0 }
  0xe3   : > { %v418_v34 = vadd.f32 %v806_v32, %v417_v33 }
  0xe4   : > { %v861_v35 = vpop.f32.mrf.mxu0 }
  0xe5   : > { %v421_v36 = vmax.f32 %v418_v34, 0.0 }
  0xe7   : > { %865 = vmatmul.mubr.msk.f32.vlgmr.msra.gmra.mxu1 %vm430_vm5, %v421_v36 }
  0xe8   : > { %871 = vmatprep.mubr.msk.f32.mxu1 %vm543_vm7, %v541_v58 }
 0x1a7   : > { %v504_v38 = vpop.f32.mrf.mxu1 }
 0x1a8   : > { %v505_v39 = vadd.f32 %v808_v37, %v504_v38 }
 0x1a9   : > { %v866_v40 = vpop.f32.mrf.mxu1 }
 0x1aa   : > { %v509_v41 = vsel %vm508_vm6, %v505_v39, 0.0 }
 0x1ab   : > { %v510_v42 = vrot.slane %v509_v41, 4 }
 0x1ad   : > { %v511_v43 = vadd.f32 %v510_v42, %v509_v41 }
 0x1af   : > { %v512_v44 = vrot.slane %v511_v43, 2 }
 0x1b1   : > { %v513_v45 = vadd.f32 %v512_v44, %v511_v43 }
 0x1b3   : > { %v514_v46 = vrot.slane %v513_v45, 1 }
 0x1b5   : > { %v515_v47 = vadd.f32 %v514_v46, %v513_v45 }
 0x1b7   : > { %v811_v48 = vmul.f32 -1.442695, %v515_v47 }
 0x1b9   : > { %894 = vpow2.f32 %v811_v48 }
 0x1c6   : > { %v895_v49 = vpop.eup %894 }
 0x1c7   : > { %v519_v50 = vadd.f32 1.0, %v895_v49 }
 0x1c9   : > { %896 = vrcp.f32 %v519_v50 }
 0x1d6   : > { %v897_v51 = vpop.eup %896 }
 0x1d7   : > { %v523_v52 = vmul.f32 %v897_v51, %v995_v6  ;;  %v1030_v53 = vmul.f32 %v897_v51, %v993_v5 }
 0x1d9   : > { %v536_v54 = vsel %vm311_vm2, %v523_v52, -inf  ;;  %v533_v55 = vsel %vm309_vm1, %v1030_v53, -inf  ;;  %v527_v56 = vsel %vm311_vm2, %v523_v52, 0.0  ;;  %v524_v57 = vsel %vm309_vm1, %v1030_v53, 0.0 }
 0x1da   : > { %537 = vmax.xlane.f32.xlu0 %v536_v54  ;;  %534 = vmax.xlane.f32.xlu1 %v533_v55 }
 0x1de   : > { %528 = vadd.xlane.f32.xlu0 %v527_v56  ;;  %525 = vadd.xlane.f32.xlu1 %v524_v57 }
 0x263   : > { %v538_v59 = vpop.xlane.xlu0 %537  ;;  %v535_v60 = vpop.xlane.xlu1 %534 }
 0x264   : > { %867 = vmatprep.subr.msk.mxu1 %vm331_vm3, %v538_v59 }
 0x265   : > { %868 = vmatpush3.msk.msra.mxu1 %vm331_vm3, %v538_v59 }
 0x266   : > { %869 = vmatprep.subr.mxu1 %v535_v60 }
 0x267   : > { %v529_v63 = vpop.xlane.xlu0 %528  ;;  %870 = vmatpush3.msra.mxu1 %v535_v60  ;;  %v526_v0 = vpop.xlane.xlu1 %525 }
 0x268   : > { %v532_v1 = vmul.f32 0.015625, %v529_v63  ;;  %872 = vmatmul.mubr.msk.f32.vlgmr.msra.gmra.mxu1 %vm543_vm7, %v542_v61  ;;  %v531_v2 = vmul.f32 0.015625, %v526_v0 }
 0x269   : > { %878 = vmatprep.mubr.msk.f32.mxu1 %vm543_vm7, %v539_v62 }
 0x26a   : > { %874 = vmatprep.subr.msk.mxu1 %vm331_vm3, %v532_v1 }
 0x26b   : > { %875 = vmatpush3.msk.msra.mxu1 %vm331_vm3, %v532_v1 }
 0x26c   : > { %876 = vmatprep.subr.mxu1 %v531_v2 }
 0x26d   : > { %877 = vmatpush3.msra.mxu1 %v531_v2 }
 0x26e   : > { %879 = vmatmul.mubr.msk.f32.vlgmr.msra.gmra.mxu1 %vm543_vm7, %v540_v3 }
 0x328   : > { %v873_v5 = vpop.f32.mrf.mxu1 }
 0x32a   : > { %v619_v6 = vpop.f32.mrf.mxu1 }
 0x32e   : > { %v880_v7 = vpop.f32.mrf.mxu1 }
 0x32f   : > { %v709_v9 = vadd.f32 %v880_v7, %v873_v5 }
 0x330   : > { %v703_v10 = vpop.f32.mrf.mxu1 }
 0x331   : > { %v715_v11 = vadd.f32 %v713_v8, %v709_v9  ;;  %v704_v12 = vadd.f32 %v703_v10, %v619_v6 }
 0x333   : > { %v819_v13 = vmul.f32 -1.442695, %v715_v11  ;;  %v714_v14 = vadd.f32 %v713_v8, %v704_v12 }
 0x335   : > { %898 = vpow2.f32 %v819_v13  ;;  %v818_v15 = vmul.f32 -1.442695, %v714_v14 }
 0x337   : > { %900 = vpow2.f32 %v818_v15 }
 0x342   : > { %v899_v16 = vpop.eup %898 }
 0x343   : > { %v723_v17 = vadd.f32 1.0, %v899_v16 }
 0x344   : > { %v901_v18 = vpop.eup %900 }
 0x345   : > { %902 = vrcp.f32 %v723_v17  ;;  %v722_v19 = vadd.f32 1.0, %v901_v18 }
 0x347   : > { %904 = vrcp.f32 %v722_v19 }
 0x352   : > { %v903_v20 = vpop.eup %902 }
 0x353   : > { %735 = vperm.xlu1 %893, %v903_v20  }
 0x354   : > { %v905_v21 = vpop.eup %904 }
 0x355   : > { %730 = vperm.xlu0 %892, %v905_v21  }
 0x3ce   : > { %v736_v22 = vpop.permute.xlu1 %735 }
 0x3cf   : > { %v739_v23 = vmul.f32 %v736_v22, %v523_v52 }
 0x3d0   : > { %v731_v24 = vpop.permute.xlu0 %730 }
 0x3d1   : > { %741 = vst.msk [vmem:[%s306_s25 + $0x8] sm:$0x1] %vm311_vm2, %v739_v23  ;;  %v738_v25 = vmul.f32 %v731_v24, %v1030_v53 }
 0x3d3   : > { %740 = vst.msk [vmem:[%s306_s25] sm:$0xff] %vm309_vm1, %v738_v25 }
 0x3d4 PF: > { %s19_s29 = sadd.s32 1, %s912_s29  }
 0x3d5   : > { %p16_p4 = scmp.ge.s32.totalorder %s19_s29, 4  }
 0x3d7   :  { %18 = sbr.rel (!%p16_p4) target bundleno = 2 (0x2), region = 82 }

// kernel: decoder_forward_pallas.7
= control target key start
LH: loop header
LB: loop body
LE: loop exit
PB: predicated region body
PF: predicated region fallthrough
CT: control target
= control target key end

     0   :  { %vm357_vm0 = vcmask 523264   ;;  %s882_s1 = inlined_call_operand.vmem [shape: bf16[576,128], index: 1, kind: input, shape index: {}]   ;;  %s883_s0 = inlined_call_operand.vmem [shape: bf16[18,576], index: 0, kind: input, shape index: {}]   ;;  %s884_s2 = inlined_call_operand.vmem [shape: f32[1,128], index: 2, kind: input, shape index: {}]   ;;  %s885_s3 = inlined_call_operand.vmem [shape: f32[1,128], index: 3, kind: input, shape index: {}]   ;;  %s886_s4 = inlined_call_operand.vmem [shape: f32[18,128], index: 4, kind: output, shape index: {}]  }
   0x1   :  { %v662_v0 = vld [vmem:[%s882_s1 + $0x78] sm:$0xff]   ;;  %v666_v4 = vld [vmem:[%s882_s1 + $0x70] sm:$0xff]   ;;  %v670_v8 = vld [vmem:[%s882_s1 + $0x68] sm:$0xff]  }
   0x2   :  { %v663_v1 = vld [vmem:[%s882_s1 + $0xf8] sm:$0xff]   ;;  %588 = vmatprep.subr.bf16.mxu0 %v662_v0  ;;  %v667_v5 = vld [vmem:[%s882_s1 + $0xf0] sm:$0xff]   ;;  %v671_v9 = vld [vmem:[%s882_s1 + $0xe8] sm:$0xff]  }
   0x3   :  { %v664_v2 = vld [vmem:[%s882_s1 + $0x38] sm:$0xff]   ;;  %616 = vmatprep.subr.bf16.mxu1 %v663_v1  ;;  %v668_v6 = vld [vmem:[%s882_s1 + $0x30] sm:$0xff]   ;;  %v672_v10 = vld [vmem:[%s882_s1 + $0x28] sm:$0xff]  }
   0x4   :  { %v665_v3 = vld [vmem:[%s882_s1 + $0xb8] sm:$0xff]   ;;  %589 = vmatpush3.bf16.msra.mxu0 %v664_v2  ;;  %v669_v7 = vld [vmem:[%s882_s1 + $0xb0] sm:$0xff]   ;;  %v673_v11 = vld [vmem:[%s882_s1 + $0xa8] sm:$0xff]  }
   0x5   :  { %617 = vmatpush3.bf16.msra.mxu1 %v665_v3  ;;  %590 = vmatprep.subr.bf16.mxu0 %v666_v4  ;;  %v674_v12 = vld [vmem:[%s882_s1 + $0x60] sm:$0xff]   ;;  %v678_v16 = vld [vmem:[%s882_s1 + $0x58] sm:$0xff]   ;;  %v682_v20 = vld [vmem:[%s882_s1 + $0x50] sm:$0xff]  }
   0x6   :  { %618 = vmatprep.subr.bf16.mxu1 %v667_v5  ;;  %v675_v13 = vld [vmem:[%s882_s1 + $0xe0] sm:$0xff]   ;;  %v679_v17 = vld [vmem:[%s882_s1 + $0xd8] sm:$0xff]   ;;  %v683_v21 = vld [vmem:[%s882_s1 + $0xd0] sm:$0xff]  }
   0x7   :  { %v676_v14 = vld [vmem:[%s882_s1 + $0x20] sm:$0xff]   ;;  %v680_v18 = vld [vmem:[%s882_s1 + $0x18] sm:$0xff]   ;;  %v684_v22 = vld [vmem:[%s882_s1 + $0x10] sm:$0xff]  }
   0x8   :  { %591 = vmatpush3.bf16.msra.mxu0 %v668_v6  ;;  %v677_v15 = vld [vmem:[%s882_s1 + $0xa0] sm:$0xff]   ;;  %v681_v19 = vld [vmem:[%s882_s1 + $0x98] sm:$0xff]   ;;  %v685_v23 = vld [vmem:[%s882_s1 + $0x90] sm:$0xff]  }
   0x9   :  { %619 = vmatpush3.bf16.msra.mxu1 %v669_v7  ;;  %592 = vmatprep.subr.bf16.mxu0 %v670_v8  ;;  %v686_v24 = vld [vmem:[%s882_s1 + $0x48] sm:$0xff]   ;;  %v690_v28 = vld [vmem:[%s882_s1 + $0x40] sm:$0xff]   ;;  %v700_v36 = vld [vmem:[%s882_s1 + $0x118] sm:$0xff]  }
   0xa   :  { %620 = vmatprep.subr.bf16.mxu1 %v671_v9  ;;  %v687_v25 = vld [vmem:[%s882_s1 + $0xc8] sm:$0xff]   ;;  %v691_v29 = vld [vmem:[%s882_s1 + $0xc0] sm:$0xff]   ;;  %v701_v37 = vld [vmem:[%s882_s1 + $0x110] sm:$0xff]  }
   0xb   :  { %v688_v26 = vld [vmem:[%s882_s1 + $0x8] sm:$0xff]   ;;  %v692_v30 = vld [vmem:[%s882_s1] sm:$0xff]   ;;  %v25_v40 = vld [vmem:[%s883_s0 + $0x30] sm:$0x11] }
   0xc   :  { %593 = vmatpush3.bf16.msra.mxu0 %v672_v10  ;;  %v689_v27 = vld [vmem:[%s882_s1 + $0x88] sm:$0xff]   ;;  %v693_v31 = vld [vmem:[%s882_s1 + $0x80] sm:$0xff]   ;;  %v546_v41 = vcombine.high %v25_v40, %v25_v40  ;;  %v545_v44 = vcombine.low %v25_v40, %v25_v40  ;;  %v709_v47 = vld [vmem:[%s883_s0 + $0x38] ss:$0 sps:$4 sm:$0x11]  }
   0xd   :  { %621 = vmatpush3.bf16.msra.mxu1 %v673_v11  ;;  %594 = vmatprep.subr.bf16.mxu0 %v674_v12  ;;  %v694_v32 = vld [vmem:[%s883_s0] ss:$20 sps:$4 sm:$0xff]   ;;  %v696_v33 = vld [vmem:[%s883_s0 + $0x4] ss:$20 sps:$4 sm:$0xff]   ;;  %v697_v34 = vld [vmem:[%s883_s0 + $0x8] ss:$20 sps:$4 sm:$0xff]  }
   0xe   :  { %622 = vmatprep.subr.bf16.mxu1 %v675_v13  ;;  %v699_v35 = vld [vmem:[%s883_s0 + $0xc] ss:$20 sps:$4 sm:$0xff]   ;;  %396 = vmatprep.mubr.bf16.mxu0 %v696_v33  ;;  %v708_v45 = vld [vmem:[%s883_s0 + $0x10] ss:$20 sps:$4 sm:$0xff]  }
   0xf   :  { %444 = vmatprep.mubr.bf16.mxu1 %v699_v35  ;;  %v24_v38 = vld [vmem:[%s883_s0 + $0x28] sm:$0x11]  ;;  %v707_v46 = vld [vmem:[%s882_s1 + $0x100] sm:$0xff]  }
  0x10   :  { %595 = vmatpush3.bf16.msra.mxu0 %v676_v14  ;;  %v544_v39 = vcombine.high %v24_v38, %v24_v38  ;;  %v706_v42 = vld [vmem:[%s882_s1 + $0x108] sm:$0xff]   ;;  %v543_v43 = vcombine.low %v24_v38, %v24_v38  ;;  %v586_v6 = vld [vmem:[%s884_s2] ss:$0 sm:$0xff] }
  0x11   :  { %623 = vmatpush3.bf16.msra.mxu1 %v677_v15  ;;  %596 = vmatprep.subr.bf16.mxu0 %v678_v16  ;;  %v587_v11 = vld [vmem:[%s885_s3] ss:$0 sm:$0xff] }
  0x12   :  { %624 = vmatprep.subr.bf16.mxu1 %v679_v17 }
  0x14   :  { %597 = vmatpush3.bf16.msra.mxu0 %v680_v18 }
  0x15   :  { %625 = vmatpush3.bf16.msra.mxu1 %v681_v19  ;;  %598 = vmatprep.subr.bf16.mxu0 %v682_v20 }
  0x16   :  { %626 = vmatprep.subr.bf16.mxu1 %v683_v21 }
  0x18   :  { %599 = vmatpush3.bf16.msra.mxu0 %v684_v22 }
  0x19   :  { %627 = vmatpush3.bf16.msra.mxu1 %v685_v23  ;;  %600 = vmatprep.subr.bf16.mxu0 %v686_v24 }
  0x1a   :  { %628 = vmatprep.subr.bf16.mxu1 %v687_v25 }
  0x1c   :  { %601 = vmatpush3.bf16.msra.mxu0 %v688_v26 }
  0x1d   :  { %629 = vmatpush3.bf16.msra.mxu1 %v689_v27  ;;  %602 = vmatprep.subr.bf16.mxu0 %v690_v28 }
  0x1e   :  { %630 = vmatprep.subr.bf16.mxu1 %v691_v29 }
  0x20   :  { %603 = vmatpush3.bf16.msra.mxu0 %v692_v30 }
  0x21   :  { %631 = vmatpush3.bf16.msra.mxu1 %v693_v31  ;;  %650 = vmatprep.subr.bf16.mxu0 %v700_v36 }
  0x23   :  { %397 = vmatmul.mubr.bf16.vlgmr.msra.gmra.mxu0 %v694_v32 }
  0x24   :  { %445 = vmatmul.mubr.bf16.vlgmr.msra.gmra.mxu1 %v697_v34  ;;  %651 = vmatpush3.bf16.msra.mxu0 %v700_v36 }
  0x25   :  { %652 = vmatprep.subr.bf16.mxu0 %v701_v37  ;;  %404 = vmatprep.mubr.bf16.mxu0 %v544_v39 }
  0x26   :  { %452 = vmatprep.mubr.bf16.mxu1 %v546_v41 }
  0x28   :  { %653 = vmatpush3.bf16.msra.mxu0 %v701_v37 }
  0x29   :  { %654 = vmatprep.subr.bf16.mxu0 %v706_v42 }
  0x2b   :  { %405 = vmatmul.mubr.bf16.gmra.mxu0 %v543_v43 }
  0x2c   :  { %453 = vmatmul.mubr.bf16.gmra.mxu1 %v545_v44  ;;  %658 = vmatprep.mubr.msk.bf16.mxu0 %vm357_vm0, %v708_v45 }
  0x2d   :  { %655 = vmatpush3.bf16.msra.mxu0 %v706_v42 }
  0x2e   :  { %656 = vmatprep.subr.bf16.mxu0 %v707_v46 }
  0x31   :  { %657 = vmatpush3.bf16.msra.mxu0 %v707_v46 }
  0x34   :  { %659 = vmatmul.mubr.msk.bf16.vlgmr.msra.gmra.mxu0 %vm357_vm0, %v709_v47 }
  0xe3   :  { %v604_v48 = vpop.f32.mrf.mxu0 }
  0xe4   :  { %v632_v49 = vpop.f32.mrf.mxu1 }
  0xe5   :  { %v605_v50 = vpop.f32.mrf.mxu0 }
  0xe6   :  { %v633_v51 = vpop.f32.mrf.mxu1  ;;  %v606_v0 = vadd.f32 %v605_v50, %v604_v48 }
  0xe7   :  { %v607_v52 = vpop.f32.mrf.mxu0  ;;  %v634_v1 = vadd.f32 %v633_v51, %v632_v49 }
  0xe8   :  { %v635_v53 = vpop.f32.mrf.mxu1 }
  0xe9   :  { %v608_v54 = vpop.f32.mrf.mxu0  ;;  %v447_v10 = vadd.f32 %v634_v1, %v606_v0 }
  0xea   :  { %v636_v55 = vpop.f32.mrf.mxu1  ;;  %v609_v7 = vadd.f32 %v608_v54, %v607_v52 }
  0xeb   :  { %v610_v56 = vpop.f32.mrf.mxu0  ;;  %v637_v8 = vadd.f32 %v636_v55, %v635_v53 }
  0xec   :  { %v638_v57 = vpop.f32.mrf.mxu1 }
  0xed   :  { %v611_v58 = vpop.f32.mrf.mxu0  ;;  %v450_v18 = vadd.f32 %v637_v8, %v609_v7 }
  0xee   :  { %v639_v59 = vpop.f32.mrf.mxu1  ;;  %v612_v60 = vadd.f32 %v611_v58, %v610_v56 }
  0xef   :  { %v640_v61 = vadd.f32 %v639_v59, %v638_v57  ;;  %v613_v62 = vpop.f32.mrf.mxu0 }
  0xf0   :  { %v641_v63 = vpop.f32.mrf.mxu1 }
  0xf1   :  { %v614_v2 = vpop.f32.mrf.mxu0  ;;  %v455_v4 = vadd.f32 %v640_v61, %v612_v60 }
  0xf2   :  { %v642_v3 = vpop.f32.mrf.mxu1 }
  0xf4   :  { %v660_v5 = vpop.f32.mrf.mxu0 }
  0xf5   :  { %v503_v9 = vadd.f32 %v660_v5, %v455_v4 }
  0xf6   :  { %v494_v12 = vpop.f32.mrf.mxu0 }
  0xf7   :  { %v517_v13 = vmul.f32 %v586_v6, %v503_v9  ;;  %v495_v14 = vadd.f32 %v494_v12, %v447_v10 }
  0xf8   :  { %v661_v15 = vpop.f32.mrf.mxu0 }
  0xf9   :  { %v527_v16 = vadd.f32 %v587_v11, %v517_v13  ;;  %v515_v17 = vmul.f32 %v586_v6, %v495_v14 }
  0xfa   :  { %v497_v19 = vpop.f32.mrf.mxu0 }
  0xfb   :  { %v530_v20 = vmax.f32 %v527_v16, 0.0  ;;  %v525_v21 = vadd.f32 %v587_v11, %v515_v17  ;;  %v498_v22 = vadd.f32 %v497_v19, %v450_v18 }
  0xfd   :  { %533 = vst [vmem:[%s886_s4 + $0x10] sm:$0x3] %v530_v20  ;;  %v528_v23 = vmax.f32 %v525_v21, 0.0  ;;  %v516_v24 = vmul.f32 %v586_v6, %v498_v22 }
  0xff   :  { %531 = vst [vmem:[%s886_s4] sm:$0xff] %v528_v23  ;;  %v526_v25 = vadd.f32 %v587_v11, %v516_v24 }
 0x101   :  { %v529_v26 = vmax.f32 %v526_v25, 0.0 }
 0x103   :  { %532 = vst [vmem:[%s886_s4 + $0x8] sm:$0xff] %v529_v26 }

// kernel: decoder_forward_pallas.8
= control target key start
LH: loop header
LB: loop body
LE: loop exit
PB: predicated region body
PF: predicated region fallthrough
CT: control target
= control target key end

     0   :  { %s1151_s29 = smov 0   ;;  %s1351_s0 = inlined_call_operand.vmem [shape: f32[2,36,32], index: 0, kind: input, shape index: {}]   ;;  %s1352_s1 = inlined_call_operand.vmem [shape: f32[32,2], index: 1, kind: input, shape index: {}]   ;;  %s1353_s2 = inlined_call_operand.vmem [shape: f32[1,2], index: 2, kind: input, shape index: {}]   ;;  %s1354_s3 = inlined_call_operand.vmem [shape: f32[2,32], index: 3, kind: input, shape index: {}]   ;;  %s1355_s4 = inlined_call_operand.vmem [shape: f32[1,32], index: 4, kind: input, shape index: {}]   ;;  %s1356_s5 = inlined_call_operand.vmem [shape: f32[36,36], index: 5, kind: input, shape index: {}]   ;;  %s1357_s6 = inlined_call_operand.vmem [shape: f32[36,36], index: 6, kind: input, shape index: {}]   ;;  %s1358_s7 = inlined_call_operand.<no memory space> [shape: f32[1], index: 7, kind: input, shape index: {}]   ;;  %s1359_s8 = inlined_call_operand.vmem [shape: f32[2,36,32], index: 8, kind: output, shape index: {}]  }
   0x1   :  { %13 = sst [smem:[#allocation2]] %s1358_s7 }
   0x2 LB: > { %s929_s30 = sadd.s32 4294967295, %s1098_s29   ;;  %p933_p0 = scmp.ge.s32.totalorder %s1098_s29, 1  ;;  %s1098_s29 = sphi %s1151_s29, %s19_s29  }
   0x3   : > { %p263_p1 = scmp.lt.s32.totalorder %s1098_s29, 3 }
   0x5   : > { %p264_p2 = pnand %p933_p0, %p263_p1 }
   0x6   : > { %p297_p3 = scmp.lt.s32.totalorder (!%p264_p2), %s929_s30, 1  ;;  %s802_s26 = sld [smem:[#allocation2]] (!%p264_p2) }
   0x7   : > { %267 = sbr.rel (%p264_p2) target bundleno = 1011 (0x3f3), region = 52 }
   0xc   : > { %v351_v0 = vld [vmem:[%s1352_s1 + $0x18] sm:$0xff]  ;;  %v1100_v1 = vmov 0.0   ;;  %v350_v2 = vld [vmem:[%s1352_s1 + $0x10] sm:$0xff]  ;;  %vm1101_vm0 = vmmov 0   ;;  %s1361_s30 = smov (!%p297_p3, %s929_s30), 1  ;;  %v349_v3 = vld [vmem:[%s1352_s1 + $0x8] sm:$0xff] }
   0xd   : > { %988 = vmatprep.subr.mxu0 %v1100_v1  ;;  %996 = vmatprep.mubr.msk.f32.mxu0 %vm1101_vm0, %v1100_v1  ;;  %s1054_s14 = smul.u32 40, %s1361_s30  ;;  %v348_v4 = vld [vmem:[%s1352_s1] sm:$0xff]  ;;  %vm312_vm1 = vcmask 261120   ;;  %vm320_vm2 = vcmask 257024   ;;  %vm346_vm3 = vcmask 1040384   ;;  %vm445_vm4 = vcmask 1041408  }
   0xe   : > { %989 = vmatpush3.msra.mxu0 %v351_v0  ;;  %999 = vmatprep.subr.mxu1 %v1100_v1  ;;  %v433_v42 = vld [vmem:[%s1354_s3] sm:$0x3]  ;;  %vm441_vm5 = vcmask 15360   ;;  %vm519_vm6 = vcmask 254976   ;;  %vm600_vm7 = vcmask 1043456   ;;  %vm584_vm8 = vcmask 293888  }
   0xf   : > { %990 = vmatprep.subr.mxu0 %v1100_v1  ;;  %1001 = vmatprep.mubr.msk.f32.mxu1 %vm1101_vm0, %v1100_v1  ;;  %s301_s19 = scalar_lea.vmem %s1351_s0, %s1054_s14  ;;  %v936_v43 = vld [vmem:[%s1353_s2] ss:$0 sm:$0xff]  ;;  %s306_s9 = scalar_lea.vmem %s1359_s8, %s1054_s14 }
  0x10   : > { %991 = vmatpush3.msra.mxu0 %v350_v2  ;;  %v1188_v5 = vld [vmem:[%s301_s19] sm:$0xff]  ;;  %v1190_v6 = vld [vmem:[%s301_s19 + $0x8] sm:$0xff]  ;;  %v1192_v7 = vld [vmem:[%s301_s19 + $0x10] sm:$0xff]  ;;  %1000 = vmatpush3.msk.msra.mxu1 %vm445_vm4, %v433_v42 }
  0x11   : > { %992 = vmatprep.subr.mxu0 %v1100_v1  ;;  %v1194_v8 = vld [vmem:[%s301_s19 + $0x18] sm:$0xff]  ;;  %v1196_v9 = vld [vmem:[%s301_s19 + $0x20] sm:$0xf]  ;;  %v313_v10 = vsel %vm312_vm1, %v1188_v5, 0.0  ;;  %v314_v11 = vsel %vm312_vm1, %v1190_v6, 0.0  ;;  %v316_v12 = vsel %vm312_vm1, %v1192_v7, 0.0  ;;  %1004 = vmatprep.subr.mxu1 %v1100_v1 }
  0x12   : > { %993 = vmatpush3.msra.mxu0 %v349_v3  ;;  %v315_v13 = vadd.f32 %v314_v11, %v313_v10  ;;  %v318_v14 = vsel %vm312_vm1, %v1194_v8, 0.0  ;;  %v331_v15 = vsel %vm312_vm1, %v1188_v5, -inf  ;;  %v332_v16 = vsel %vm312_vm1, %v1190_v6, -inf  ;;  %v938_v48 = vld [vmem:[%s1355_s4] ss:$0 sm:$0xff] }
  0x13   : > { %994 = vmatprep.subr.mxu0 %v1100_v1  ;;  %v333_v17 = vsel %vm312_vm1, %v1192_v7, -inf  ;;  %v334_v18 = vsel %vm312_vm1, %v1194_v8, -inf  ;;  %v335_v19 = vsel %vm320_vm2, %v1196_v9, -inf  ;;  %v321_v23 = vsel %vm320_vm2, %v1196_v9, 0.0 }
  0x14   : > { %995 = vmatpush3.msra.mxu0 %v348_v4  ;;  %v317_v20 = vadd.f32 %v316_v12, %v315_v13  ;;  %v336_v21 = vmax.f32 %v331_v15, %v335_v19  ;;  %v338_v22 = vmax.f32 %v333_v17, %v334_v18 }
  0x15   : > { %1029 = vmatprep.subr.mxu0 %v1100_v1 }
  0x16   : > { %v319_v24 = vadd.f32 %v318_v14, %v317_v20  ;;  %v337_v25 = vmax.f32 %v336_v21, %v332_v16 }
  0x18   : > { %v322_v26 = vadd.f32 %v321_v23, %v319_v24  ;;  %v339_v27 = vmax.f32 %v337_v25, %v338_v22 }
  0x1a   : > { %v323_v28 = vrot.slane %v322_v26, 4  ;;  %v340_v29 = vrot.slane %v339_v27, 4 }
  0x1c   : > { %v324_v30 = vadd.f32 %v323_v28, %v322_v26  ;;  %v341_v31 = vmax.f32 %v339_v27, %v340_v29  ;;  %v574_v28 = vld [vmem:[%s1356_s5] sm:$0xff] }
  0x1e   : > { %v325_v32 = vrot.slane %v324_v30, 2  ;;  %v342_v33 = vrot.slane %v341_v31, 2 }
  0x20   : > { %v326_v34 = vadd.f32 %v325_v32, %v324_v30  ;;  %v343_v35 = vmax.f32 %v341_v31, %v342_v33  ;;  %v579_v30 = vld [vmem:[%s1357_s6] sm:$0xff]  ;;  %v575_v31 = vld [vmem:[%s1356_s5 + $0x8] sm:$0xff] }
  0x21   : > { %v580_v33 = vld [vmem:[%s1357_s6 + $0x8] sm:$0xff] }
  0x22   : > { %v327_v36 = vrot.slane %v326_v34, 1  ;;  %v344_v37 = vrot.slane %v343_v35, 1 }
  0x24   : > { %v328_v38 = vadd.f32 %v327_v36, %v326_v34  ;;  %v345_v39 = vmax.f32 %v343_v35, %v344_v37  ;;  %v576_v34 = vld [vmem:[%s1356_s5 + $0x10] sm:$0xff]  ;;  %v577_v36 = vld [vmem:[%s1356_s5 + $0x18] sm:$0xff] }
  0x25   : > { %v581_v35 = vld [vmem:[%s1357_s6 + $0x10] sm:$0xff]  ;;  %v582_v37 = vld [vmem:[%s1357_s6 + $0x18] sm:$0xff] }
  0x26   : > { %v330_v40 = vmul.f32 0.027777778, %v328_v38  ;;  %v578_v38 = vld [vmem:[%s1356_s5 + $0x20] sm:$0xf] }
  0x28   : > { %v347_v41 = vsel %vm346_vm3, %v330_v40, %v345_v39  ;;  %v583_v39 = vld [vmem:[%s1357_s6 + $0x20] sm:$0xf]  ;;  %v1102_v40 = vmov 0  }
  0x29   : > { %997 = vmatmul.mubr.msk.f32.vlgmr.msra.gmra.mxu0 %vm312_vm1, %v347_v41  ;;  %1066 = vset.pattern.permute.xlu0 %v1102_v40 }
  0x2a   : > { %1039 = vmatprep.mubr.msk.f32.mxu0 %vm1101_vm0, %v1100_v1  ;;  %1067 = vset.pattern.permute.xlu1 %v1102_v40 }
  0xe9   : > { %v428_v44 = vpop.f32.mrf.mxu0 }
  0xea   : > { %v429_v45 = vadd.f32 %v936_v43, %v428_v44  ;;  %v803_v44 = vstv %s802_s26 }
  0xeb   : > { %v998_v46 = vpop.f32.mrf.mxu0 }
  0xec   : > { %v432_v47 = vmax.f32 %v429_v45, 0.0 }
  0xee   : > { %1002 = vmatmul.mubr.msk.f32.vlgmr.msra.gmra.mxu1 %vm441_vm5, %v432_v47 }
  0xef   : > { %1014 = vmatprep.mubr.msk.f32.mxu1 %vm1101_vm0, %v1100_v1 }
 0x1ae   : > { %v515_v49 = vpop.f32.mrf.mxu1 }
 0x1af   : > { %v516_v50 = vadd.f32 %v938_v48, %v515_v49 }
 0x1b0   : > { %v1003_v51 = vpop.f32.mrf.mxu1 }
 0x1b1   : > { %v520_v52 = vsel %vm519_vm6, %v516_v50, 0.0 }
 0x1b2   : > { %v521_v53 = vrot.slane %v520_v52, 4 }
 0x1b4   : > { %v522_v54 = vadd.f32 %v521_v53, %v520_v52 }
 0x1b6   : > { %v523_v55 = vrot.slane %v522_v54, 2 }
 0x1b8   : > { %v524_v56 = vadd.f32 %v523_v55, %v522_v54 }
 0x1ba   : > { %v525_v57 = vrot.slane %v524_v56, 1 }
 0x1bc   : > { %v526_v58 = vadd.f32 %v525_v57, %v524_v56 }
 0x1be   : > { %v941_v59 = vmul.f32 -1.442695, %v526_v58 }
 0x1c0   : > { %1068 = vpow2.f32 %v941_v59 }
 0x1cd   : > { %v1069_v60 = vpop.eup %1068 }
 0x1ce   : > { %v530_v61 = vadd.f32 1.0, %v1069_v60 }
 0x1d0   : > { %1070 = vrcp.f32 %v530_v61 }
 0x1dd   : > { %v1071_v62 = vpop.eup %1070 }
 0x1de   : > { %v1235_v63 = vmul.f32 %v1071_v62, %v1196_v9  ;;  %v1242_v3 = vmul.f32 %v1071_v62, %v1194_v8  ;;  %v1245_v4 = vmul.f32 %v1071_v62, %v1192_v7  ;;  %v1252_v11 = vmul.f32 %v1071_v62, %v1190_v6 }
 0x1df   : > { %v1259_v12 = vmul.f32 %v1071_v62, %v1188_v5 }
 0x1e0   : > { %v571_v0 = vsel %vm320_vm2, %v1235_v63, -inf  ;;  %v550_v2 = vsel %vm320_vm2, %v1235_v63, 0.0  ;;  %v547_v10 = vsel %vm312_vm1, %v1242_v3, 0.0  ;;  %v544_v9 = vsel %vm312_vm1, %v1245_v4, 0.0 }
 0x1e1   : > { %572 = vmax.xlane.f32.xlu1 %v571_v0  ;;  %551 = vadd.xlane.f32.xlu0 %v550_v2  ;;  %v568_v8 = vsel %vm312_vm1, %v1242_v3, -inf  ;;  %v541_v7 = vsel %vm312_vm1, %v1252_v11, 0.0  ;;  %v565_v13 = vsel %vm312_vm1, %v1245_v4, -inf  ;;  %v538_v6 = vsel %vm312_vm1, %v1259_v12, 0.0 }
 0x1e2   : > { %v562_v14 = vsel %vm312_vm1, %v1252_v11, -inf  ;;  %v559_v15 = vsel %vm312_vm1, %v1259_v12, -inf }
 0x1e5   : > { %548 = vadd.xlane.f32.xlu0 %v547_v10  ;;  %545 = vadd.xlane.f32.xlu1 %v544_v9 }
 0x1e9   : > { %569 = vmax.xlane.f32.xlu0 %v568_v8  ;;  %542 = vadd.xlane.f32.xlu1 %v541_v7 }
 0x1ed   : > { %566 = vmax.xlane.f32.xlu0 %v565_v13  ;;  %539 = vadd.xlane.f32.xlu1 %v538_v6 }
 0x1f1   : > { %563 = vmax.xlane.f32.xlu0 %v562_v14  ;;  %560 = vmax.xlane.f32.xlu1 %v559_v15 }
 0x26a   : > { %v573_v5 = vpop.xlane.xlu1 %572  ;;  %v552_v16 = vpop.xlane.xlu0 %551 }
 0x26b   : > { %v558_v17 = vmul.f32 0.03125, %v552_v16  ;;  %1005 = vmatpush3.msk.msra.mxu1 %vm600_vm7, %v573_v5 }
 0x26c   : > { %1006 = vmatprep.subr.mxu1 %v1100_v1 }
 0x26d   : > { %1030 = vmatpush3.msk.msra.mxu0 %vm600_vm7, %v558_v17 }
 0x26e   : > { %v549_v18 = vpop.xlane.xlu0 %548  ;;  %v546_v19 = vpop.xlane.xlu1 %545  ;;  %1031 = vmatprep.subr.mxu0 %v1100_v1 }
 0x26f   : > { %v557_v20 = vmul.f32 0.03125, %v549_v18  ;;  %v556_v21 = vmul.f32 0.03125, %v546_v19 }
 0x271   : > { %1032 = vmatpush3.msra.mxu0 %v557_v20 }
 0x272   : > { %1033 = vmatprep.subr.mxu0 %v1100_v1  ;;  %v570_v22 = vpop.xlane.xlu0 %569  ;;  %v543_v23 = vpop.xlane.xlu1 %542 }
 0x273   : > { %v555_v24 = vmul.f32 0.03125, %v543_v23  ;;  %1007 = vmatpush3.msra.mxu1 %v570_v22  ;;  %1034 = vmatpush3.msra.mxu0 %v556_v21 }
 0x274   : > { %1035 = vmatprep.subr.mxu0 %v1100_v1  ;;  %1008 = vmatprep.subr.mxu1 %v1100_v1 }
 0x275   : > { %1036 = vmatpush3.msra.mxu0 %v555_v24 }
 0x276   : > { %v567_v25 = vpop.xlane.xlu0 %566  ;;  %v540_v26 = vpop.xlane.xlu1 %539  ;;  %1037 = vmatprep.subr.mxu0 %v1100_v1 }
 0x277   : > { %v554_v27 = vmul.f32 0.03125, %v540_v26  ;;  %1009 = vmatpush3.msra.mxu1 %v567_v25 }
 0x278   : > { %1010 = vmatprep.subr.mxu1 %v1100_v1 }
 0x279   : > { %1038 = vmatpush3.msra.mxu0 %v554_v27 }
 0x27a   : > { %v564_v29 = vpop.xlane.xlu0 %563  ;;  %1040 = vmatmul.mubr.msk.f32.vlgmr.msra.gmra.mxu0 %vm584_vm8, %v574_v28  ;;  %v561_v32 = vpop.xlane.xlu1 %560 }
 0x27b   : > { %1011 = vmatpush3.msra.mxu1 %v564_v29  ;;  %1042 = vmatprep.mubr.msk.f32.mxu0 %vm1101_vm0, %v1100_v1 }
 0x27c   : > { %1012 = vmatprep.subr.mxu1 %v1100_v1 }
 0x27d   : > { %1013 = vmatpush3.msra.mxu1 %v561_v32 }
 0x27e   : > { %1015 = vmatmul.mubr.msk.f32.vlgmr.msra.gmra.mxu1 %vm584_vm8, %v579_v30  ;;  %1043 = vmatmul.mubr.msk.f32.gmra.mxu0 %vm584_vm8, %v575_v31 }
 0x27f   : > { %1017 = vmatprep.mubr.msk.f32.mxu1 %vm1101_vm0, %v1100_v1  ;;  %1045 = vmatprep.mubr.msk.f32.mxu0 %vm1101_vm0, %v1100_v1 }
 0x282   : > { %1018 = vmatmul.mubr.msk.f32.gmra.mxu1 %vm584_vm8, %v580_v33  ;;  %1046 = vmatmul.mubr.msk.f32.gmra.mxu0 %vm584_vm8, %v576_v34 }
 0x283   : > { %1020 = vmatprep.mubr.msk.f32.mxu1 %vm1101_vm0, %v1100_v1  ;;  %1048 = vmatprep.mubr.msk.f32.mxu0 %vm1101_vm0, %v1100_v1 }
 0x286   : > { %1021 = vmatmul.mubr.msk.f32.gmra.mxu1 %vm584_vm8, %v581_v35  ;;  %1049 = vmatmul.mubr.msk.f32.gmra.mxu0 %vm584_vm8, %v577_v36 }
 0x287   : > { %1023 = vmatprep.mubr.msk.f32.mxu1 %vm1101_vm0, %v1100_v1  ;;  %1051 = vmatprep.mubr.msk.f32.mxu0 %vm1101_vm0, %v1100_v1 }
 0x28a   : > { %1024 = vmatmul.mubr.msk.f32.gmra.mxu1 %vm584_vm8, %v582_v37  ;;  %1052 = vmatmul.mubr.msk.f32.gmra.mxu0 %vm584_vm8, %v578_v38 }
 0x28b   : > { %1026 = vmatprep.mubr.msk.f32.mxu1 %vm1101_vm0, %v1100_v1 }
 0x28e   : > { %1027 = vmatmul.mubr.msk.f32.gmra.mxu1 %vm584_vm8, %v583_v39 }
 0x33a   : > { %v778_v41 = vpop.f32.mrf.mxu0 }
 0x33c   : > { %v1041_v42 = vpop.f32.mrf.mxu0 }
 0x33e   : > { %v670_v43 = vpop.f32.mrf.mxu1  ;;  %v783_v45 = vpop.f32.mrf.mxu0 }
 0x33f   : > { %v779_v46 = vadd.f32 %v778_v41, %v670_v43 }
 0x340   : > { %v1016_v47 = vpop.f32.mrf.mxu1  ;;  %v1044_v48 = vpop.f32.mrf.mxu0 }
 0x341   : > { %v804_v49 = vadd.f32 %v803_v44, %v779_v46 }
 0x342   : > { %v675_v1 = vpop.f32.mrf.mxu1  ;;  %v788_v50 = vpop.f32.mrf.mxu0 }
 0x343   : > { %v954_v51 = vmul.f32 -1.442695, %v804_v49  ;;  %v784_v52 = vadd.f32 %v783_v45, %v675_v1 }
 0x344   : > { %v1019_v53 = vpop.f32.mrf.mxu1  ;;  %v1047_v54 = vpop.f32.mrf.mxu0 }
 0x345   : > { %1072 = vpow2.f32 %v954_v51  ;;  %v805_v55 = vadd.f32 %v803_v44, %v784_v52 }
 0x346   : > { %v680_v56 = vpop.f32.mrf.mxu1  ;;  %v793_v57 = vpop.f32.mrf.mxu0 }
 0x347   : > { %v955_v58 = vmul.f32 -1.442695, %v805_v55  ;;  %v789_v59 = vadd.f32 %v788_v50, %v680_v56 }
 0x348   : > { %v1022_v60 = vpop.f32.mrf.mxu1  ;;  %v1050_v61 = vpop.f32.mrf.mxu0 }
 0x349   : > { %1074 = vpow2.f32 %v955_v58  ;;  %v806_v62 = vadd.f32 %v803_v44, %v789_v59 }
 0x34a   : > { %v685_v0 = vpop.f32.mrf.mxu1  ;;  %v798_v2 = vpop.f32.mrf.mxu0 }
 0x34b   : > { %v956_v10 = vmul.f32 -1.442695, %v806_v62  ;;  %v794_v9 = vadd.f32 %v793_v57, %v685_v0 }
 0x34c   : > { %v1025_v8 = vpop.f32.mrf.mxu1  ;;  %v1053_v7 = vpop.f32.mrf.mxu0 }
 0x34d   : > { %1076 = vpow2.f32 %v956_v10  ;;  %v807_v13 = vadd.f32 %v803_v44, %v794_v9 }
 0x34e   : > { %v690_v6 = vpop.f32.mrf.mxu1 }
 0x34f   : > { %v957_v14 = vmul.f32 -1.442695, %v807_v13  ;;  %v799_v15 = vadd.f32 %v798_v2, %v690_v6 }
 0x350   : > { %v1028_v5 = vpop.f32.mrf.mxu1 }
 0x351   : > { %1078 = vpow2.f32 %v957_v14  ;;  %v808_v16 = vadd.f32 %v803_v44, %v799_v15 }
 0x352   : > { %v1073_v17 = vpop.eup %1072 }
 0x353   : > { %v824_v18 = vadd.f32 1.0, %v1073_v17  ;;  %v958_v19 = vmul.f32 -1.442695, %v808_v16 }
 0x355   : > { %1080 = vrcp.f32 %v824_v18 }
 0x356   : > { %v1075_v20 = vpop.eup %1074  ;;  %1082 = vpow2.f32 %v958_v19 }
 0x357   : > { %v825_v21 = vadd.f32 1.0, %v1075_v20 }
 0x359   : > { %1084 = vrcp.f32 %v825_v21 }
 0x35a   : > { %v1077_v22 = vpop.eup %1076 }
 0x35b   : > { %v826_v23 = vadd.f32 1.0, %v1077_v22 }
 0x35d   : > { %1086 = vrcp.f32 %v826_v23 }
 0x35e   : > { %v1079_v24 = vpop.eup %1078 }
 0x35f   : > { %v827_v25 = vadd.f32 1.0, %v1079_v24 }
 0x361   : > { %1088 = vrcp.f32 %v827_v25 }
 0x362   : > { %v1081_v26 = vpop.eup %1080 }
 0x363   : > { %v1083_v27 = vpop.eup %1082  ;;  %841 = vperm.xlu0 %1066, %v1081_v26  }
 0x364   : > { %v828_v28 = vadd.f32 1.0, %v1083_v27 }
 0x366   : > { %v1085_v29 = vpop.eup %1084  ;;  %1090 = vrcp.f32 %v828_v28 }
 0x367   : > { %846 = vperm.xlu1 %1067, %v1085_v29  }
 0x36a   : > { %v1087_v30 = vpop.eup %1086 }
 0x36b   : > { %851 = vperm.xlu1 %1067, %v1087_v30  }
 0x36e   : > { %v1089_v31 = vpop.eup %1088 }
 0x36f   : > { %856 = vperm.xlu1 %1067, %v1089_v31  }
 0x373   : > { %v1091_v32 = vpop.eup %1090 }
 0x374   : > { %861 = vperm.xlu1 %1067, %v1091_v32  }
 0x3de   : > { %v842_v33 = vpop.permute.xlu0 %841 }
 0x3df   : > { %v864_v34 = vmul.f32 %v842_v33, %v1259_v12 }
 0x3e1   : > { %869 = vst.msk [vmem:[%s306_s9] sm:$0xff] %vm312_vm1, %v864_v34 }
 0x3e2   : > { %v847_v35 = vpop.permute.xlu1 %846 }
 0x3e3   : > { %v865_v36 = vmul.f32 %v847_v35, %v1252_v11 }
 0x3e5   : > { %870 = vst.msk [vmem:[%s306_s9 + $0x8] sm:$0xff] %vm312_vm1, %v865_v36 }
 0x3e6   : > { %v852_v37 = vpop.permute.xlu1 %851 }
 0x3e7   : > { %v866_v38 = vmul.f32 %v852_v37, %v1245_v4 }
 0x3e9   : > { %871 = vst.msk [vmem:[%s306_s9 + $0x10] sm:$0xff] %vm312_vm1, %v866_v38 }
 0x3ea   : > { %v857_v39 = vpop.permute.xlu1 %856 }
 0x3eb   : > { %v867_v40 = vmul.f32 %v857_v39, %v1242_v3 }
 0x3ed   : > { %872 = vst.msk [vmem:[%s306_s9 + $0x18] sm:$0xff] %vm312_vm1, %v867_v40 }
 0x3ef   : > { %v862_v41 = vpop.permute.xlu1 %861 }
 0x3f0   : > { %v868_v12 = vmul.f32 %v862_v41, %v1235_v63 }
 0x3f2   : > { %873 = vst.msk [vmem:[%s306_s9 + $0x20] sm:$0xf] %vm320_vm2, %v868_v12 }
 0x3f3 PF: > { %s19_s29 = sadd.s32 1, %s1098_s29  }
 0x3f4   : > { %p16_p4 = scmp.ge.s32.totalorder %s19_s29, 4  }
 0x3f6   :  { %18 = sbr.rel (!%p16_p4) target bundleno = 2 (0x2), region = 82 }

// kernel: decoder_forward_pallas.9
= control target key start
LH: loop header
LB: loop body
LE: loop exit
PB: predicated region body
PF: predicated region fallthrough
CT: control target
= control target key end

     0   :  { %s567_s9 = smov 0   ;;  %s611_s0 = inlined_call_operand.vmem [shape: bf16[3,288], index: 0, kind: input, shape index: {}]   ;;  %s612_s1 = inlined_call_operand.vmem [shape: bf16[2,288,36], index: 1, kind: input, shape index: {}]   ;;  %s613_s2 = inlined_call_operand.vmem [shape: f32[2,3,36], index: 2, kind: output, shape index: {}]  }
   0x1 LB: > { %s447_s10 = sadd.s32 4294967295, %s547_s9   ;;  %p451_p0 = scmp.ge.s32.totalorder %s547_s9, 1  ;;  %s547_s9 = sphi %s567_s9, %s12_s9  }
   0x2   : > { %p112_p1 = scmp.lt.s32.totalorder %s547_s9, 3 }
   0x4   : > { %p113_p2 = pnand %p451_p0, %p112_p1 }
   0x5   : > { %p133_p3 = scmp.lt.s32.totalorder (!%p113_p2), %s447_s10, 1 }
   0x6   : > { %116 = sbr.rel (%p113_p2) target bundleno = 262 (0x106), region = 28 }
   0xb   : > { %v185_v0 = vlaneseq  ;;  %v549_v1 = vmov 0.0   ;;  %vm550_vm0 = vmmov 0   ;;  %s615_s10 = smov (!%p133_p3, %s447_s10), 1  ;;  %v551_v2 = vmov 1983009808  }
   0xc   : > { %500 = vmatprep.subr.bf16.mxu1 %v549_v1  ;;  %504 = vmatprep.mubr.msk.bf16.mxu1 %vm550_vm0, %v549_v1  ;;  %v183_v3 = vunpack.c.l.s4 %v551_v2  ;;  %s508_s11 = smul.u32 144, %s615_s10  ;;  %v143_v6 = vld [vmem:[%s611_s0] sm:$0x3f]  ;;  %vm307_vm1 = vcmask 261120   ;;  %s453_s17 = sshll.u32 %s615_s10, 2  ;;  %vm392_vm2 = vcmask 288768  }
   0xd   : > { %v186_v4 = vshrl.u32 %v185_v0, 7  ;;  %v181_v20 = vcombine.high %v143_v6, %v143_v6  ;;  %s141_s20 = scalar_lea.vmem %s613_s2, %s453_s17 }
   0xe   : > { %v184_v5 = vunpack.c.0.s8 %v183_v3  ;;  %s584_s16 = scalar_lea.vmem %s612_s1, %s508_s11 }
   0xf   : > { %v520_v8 = vld [vmem:[%s584_s16 + $0x78] sm:$0xff]   ;;  %v522_v11 = vld [vmem:[%s584_s16 + $0x70] sm:$0xff]   ;;  %v524_v14 = vld [vmem:[%s584_s16 + $0x68] sm:$0xff]  }
  0x10   : > { %v187_v7 = vsub.s32 %v184_v5, %v186_v4  ;;  %v521_v9 = vld [vmem:[%s584_s16 + $0x38] sm:$0xff]   ;;  %475 = vmatprep.subr.bf16.mxu0 %v520_v8  ;;  %v523_v12 = vld [vmem:[%s584_s16 + $0x30] sm:$0xff]   ;;  %v525_v15 = vld [vmem:[%s584_s16 + $0x28] sm:$0xff]  }
  0x11   : > { %476 = vmatpush3.bf16.msra.mxu0 %v521_v9  ;;  %v526_v16 = vld [vmem:[%s584_s16 + $0x60] sm:$0xff]   ;;  %v528_v18 = vld [vmem:[%s584_s16 + $0x58] sm:$0xff]   ;;  %v532_v19 = vld [vmem:[%s584_s16 + $0x88] sm:$0xff]  }
  0x12   : > { %v188_v10 = vrot.slane %v143_v6, %v187_v7  ;;  %477 = vmatprep.subr.bf16.mxu0 %v522_v11  ;;  %v527_v17 = vld [vmem:[%s584_s16 + $0x20] sm:$0xff]   ;;  %v529_v21 = vld [vmem:[%s584_s16 + $0x18] sm:$0xff]   ;;  %501 = vmatpush3.bf16.msra.mxu1 %v532_v19  ;;  %v530_v23 = vld [vmem:[%s584_s16 + $0x50] sm:$0xff]   ;;  %v195_v24 = vrot.slane %v181_v20, %v187_v7 }
  0x13   : > { %502 = vmatprep.subr.bf16.mxu1 %v549_v1  ;;  %v535_v22 = vld [vmem:[%s584_s16 + $0x80] sm:$0xff]   ;;  %v531_v25 = vld [vmem:[%s584_s16 + $0x10] sm:$0xff]   ;;  %v533_v26 = vld [vmem:[%s584_s16 + $0x48] sm:$0xff]  }
  0x14   : > { %v196_v13 = vcombine.high %v188_v10, %v188_v10  ;;  %v534_v27 = vld [vmem:[%s584_s16 + $0x8] sm:$0xff]   ;;  %v536_v28 = vld [vmem:[%s584_s16 + $0x40] sm:$0xff]  }
  0x15   : > { %478 = vmatpush3.bf16.msra.mxu0 %v523_v12  ;;  %v537_v29 = vld [vmem:[%s584_s16] sm:$0xff]  }
  0x16   : > { %343 = vmatprep.mubr.bf16.mxu0 %v196_v13  ;;  %479 = vmatprep.subr.bf16.mxu0 %v524_v14 }
  0x17   : > { %503 = vmatpush3.bf16.msra.mxu1 %v535_v22 }
  0x19   : > { %480 = vmatpush3.bf16.msra.mxu0 %v525_v15 }
  0x1a   : > { %481 = vmatprep.subr.bf16.mxu0 %v526_v16  ;;  %505 = vmatmul.mubr.msk.bf16.vlgmr.msra.gmra.mxu1 %vm307_vm1, %v195_v24 }
  0x1d   : > { %482 = vmatpush3.bf16.msra.mxu0 %v527_v17 }
  0x1e   : > { %483 = vmatprep.subr.bf16.mxu0 %v528_v18 }
  0x21   : > { %484 = vmatpush3.bf16.msra.mxu0 %v529_v21 }
  0x22   : > { %485 = vmatprep.subr.bf16.mxu0 %v530_v23 }
  0x25   : > { %486 = vmatpush3.bf16.msra.mxu0 %v531_v25 }
  0x26   : > { %487 = vmatprep.subr.bf16.mxu0 %v533_v26 }
  0x29   : > { %488 = vmatpush3.bf16.msra.mxu0 %v534_v27 }
  0x2a   : > { %489 = vmatprep.subr.bf16.mxu0 %v536_v28 }
  0x2d   : > { %490 = vmatpush3.bf16.msra.mxu0 %v537_v29 }
  0x30   : > { %344 = vmatmul.mubr.bf16.vlgmr.msra.gmra.mxu0 %v188_v10 }
  0xda   : > { %v385_v30 = vpop.f32.mrf.mxu1 }
  0xdc   : > { %v506_v31 = vpop.f32.mrf.mxu1 }
  0xde   : > { %v388_v32 = vpop.f32.mrf.mxu1 }
  0xe0   : > { %v507_v33 = vpop.f32.mrf.mxu1 }
  0xf0   : > { %v491_v34 = vpop.f32.mrf.mxu0 }
  0xf2   : > { %v492_v35 = vpop.f32.mrf.mxu0 }
  0xf3   : > { %v493_v36 = vadd.f32 %v492_v35, %v491_v34 }
  0xf4   : > { %v494_v37 = vpop.f32.mrf.mxu0 }
  0xf5   : > { %v386_v38 = vadd.f32 %v493_v36, %v385_v30 }
  0xf6   : > { %v495_v39 = vpop.f32.mrf.mxu0 }
  0xf7   : > { %539 = vtanh.f32 %v386_v38 }
 0x104   : > { %v540_v40 = vpop.eup %539 }
 0x105   : > { %393 = vst.msk [vmem:[%s141_s20] sm:$0x7] %vm392_vm2, %v540_v40 }
 0x106 PF: > { %s12_s9 = sadd.s32 1, %s547_s9  }
 0x107   : > { %p9_p4 = scmp.ge.s32.totalorder %s12_s9, 4  }
 0x109   :  { %11 = sbr.rel (!%p9_p4) target bundleno = 1 (0x1), region = 58 }

</bundles_post_ra>
